<compile_context>
chip_gen: v5e
topology: v5e:2x2
jax: 0.10.0
libtpu: 0.0.40
codegen_flags: <defaults>
</compile_context>

<pallas_src>
import functools

import numpy as np

import jax
import jax.numpy as jnp
from jax import lax
from jax.experimental import pallas as pl
from jax.experimental.pallas import tpu as pltpu

KH = KW = 3
PAD = 1               # 'same' padding for 3x3, stride 1, dilation 1
NEG_SLOPE = 0.01      # nn.LeakyReLU default used by the module
EPS = 1e-5            # nn.BatchNorm2d default


# ------------------------------------------------------------------- helpers --
def _vmem_limit_bytes():
    """~75% of this generation's per-core VMEM; conservative fallback otherwise."""
    try:
        cap = getattr(pltpu.get_tpu_info(), "vmem_capacity_bytes", None)
        if cap:
            return int(cap) * 3 // 4
    except Exception:
        pass
    return 48 * 1024 * 1024


def _tap_masks(H, W):
    """(9, H*W) f32 {0,1} masks: tap (kh,kw) is valid where the shifted source pixel
    stays inside the image ('same' zero padding)."""
    h = np.arange(H)[:, None]
    w = np.arange(W)[None, :]
    rows = []
    for kh in range(KH):
        dh = kh - PAD
        for kw in range(KW):
            dw = kw - PAD
            valid = (h + dh >= 0) & (h + dh < H) & (w + dw >= 0) & (w + dw < W)
            rows.append(valid.reshape(-1))
    return jnp.asarray(np.stack(rows).astype(np.float32))


def _conv3x3_acc(x_ref, w_ref, masks_ref, *, W, HW, Cout):
    """3x3 'same' conv of one flattened image: (Cin, H*W) -> f32 (Cout, H*W).

    9 taps, each: lane-roll (XLU) + border-mask mul (VPU) + bf16 MXU dot, f32 acc.
    """
    x = x_ref[...]                     # (Cin, HW) f32
    masks = masks_ref[...]             # (9, HW)  f32
    acc = jnp.zeros((Cout, HW), jnp.float32)
    for kh in range(KH):
        for kw in range(KW):
            t = kh * KW + kw
            delta = (kh - PAD) * W + (kw - PAD)     # flat source offset
            if delta == 0:
                tap = x.astype(jnp.bfloat16)        # center tap: always valid
            else:
                shifted = pltpu.roll(x, shift=(-delta) % HW, axis=1)
                tap = (shifted * masks[t:t + 1, :]).astype(jnp.bfloat16)
            acc = acc + jnp.dot(w_ref[t], tap, preferred_element_type=jnp.float32)
    return acc


# ------------------------------------------------------------------- kernels --
def _stats_kernel(x_ref, w_ref, masks_ref, sum_ref, css_ref, *, W, HW, Cout):
    """Per-image conv + per-image (sum, centered sumsq) for BN batch statistics."""
    acc = _conv3x3_acc(x_ref, w_ref, masks_ref, W=W, HW=HW, Cout=Cout)
    s = jnp.sum(acc, axis=1, keepdims=True)                 # (Cout, 1)
    mu = s * (1.0 / HW)
    d = acc - mu
    sum_ref[...] = s
    css_ref[...] = jnp.sum(d * d, axis=1, keepdims=True)    # centered sumsq


def _conv_bn_lrelu_kernel(x_ref, w_ref, masks_ref, scale_ref, shift_ref, o_ref,
                          *, W, HW, Cout):
    """Recompute conv, apply precomputed BN scale/shift + LeakyReLU, write f32 NCHW."""
    acc = _conv3x3_acc(x_ref, w_ref, masks_ref, W=W, HW=HW, Cout=Cout)
    z = acc * scale_ref[...] + shift_ref[...]                # (Cout,1) broadcast
    o_ref[...] = jnp.where(z >= 0, z, NEG_SLOPE * z).astype(o_ref.dtype)


# ------------------------------------------------------------------- wrapper --
@jax.jit
def cblr_forward(x_nchw, w_oihw, gamma, beta):
    B, Cin, H, W = x_nchw.shape
    Cout = w_oihw.shape[0]
    HW = H * W

    x2d = x_nchw.reshape(B, Cin, HW)                                   # free reshape
    w_taps = (jnp.transpose(w_oihw, (2, 3, 0, 1))                      # (KH,KW,Cout,Cin)
              .reshape(KH * KW, Cout, Cin).astype(jnp.bfloat16))       # tiny
    masks = _tap_masks(H, W)                                           # (9, HW) f32

    cparams = pltpu.CompilerParams(
        dimension_semantics=("parallel",),
        vmem_limit_bytes=_vmem_limit_bytes())

    x_spec = pl.BlockSpec((None, Cin, HW), lambda b: (b, 0, 0))
    w_spec = pl.BlockSpec((KH * KW, Cout, Cin), lambda b: (0, 0, 0))
    m_spec = pl.BlockSpec((KH * KW, HW), lambda b: (0, 0))

    # ---- pass 1: per-image partial BN statistics (no activation written) -------
    stats_fn = pl.pallas_call(
        functools.partial(_stats_kernel, W=W, HW=HW, Cout=Cout),
        grid=(B,),
        in_specs=[x_spec, w_spec, m_spec],
        out_specs=(
            pl.BlockSpec((None, Cout, 1), lambda b: (b, 0, 0)),
            pl.BlockSpec((None, Cout, 1), lambda b: (b, 0, 0)),
        ),
        out_shape=(
            jax.ShapeDtypeStruct((B, Cout, 1), jnp.float32),
            jax.ShapeDtypeStruct((B, Cout, 1), jnp.float32),
        ),
        compiler_params=cparams,
    )
    psum, pcss = stats_fn(x2d, w_taps, masks)

    # ---- tiny batch combine + BN scale/shift (parallel-variance formula) -------
    n_img = float(HW)
    n_tot = float(B * HW)
    mu_img = psum[:, :, 0] / n_img                                     # (B, Cout)
    mean = jnp.sum(psum[:, :, 0], axis=0) / n_tot                      # (Cout,)
    var = (jnp.sum(pcss[:, :, 0], axis=0)
           + n_img * jnp.sum((mu_img - mean[None, :]) ** 2, axis=0)) / n_tot
    var = jnp.maximum(var, 0.0)
    inv_std = lax.rsqrt(var + EPS)
    g = gamma.astype(jnp.float32)
    scale = (g * inv_std).reshape(Cout, 1)
    shift = (beta.astype(jnp.float32) - mean * g * inv_std).reshape(Cout, 1)

    # ---- pass 2: conv + BN + LeakyReLU, f32 NCHW written directly --------------
    bn_fn = pl.pallas_call(
        functools.partial(_conv_bn_lrelu_kernel, W=W, HW=HW, Cout=Cout),
        grid=(B,),
        in_specs=[
            x_spec, w_spec, m_spec,
            pl.BlockSpec((Cout, 1), lambda b: (0, 0)),
            pl.BlockSpec((Cout, 1), lambda b: (0, 0)),
        ],
        out_specs=pl.BlockSpec((None, Cout, HW), lambda b: (b, 0, 0)),
        out_shape=jax.ShapeDtypeStruct((B, Cout, HW), x_nchw.dtype),
        compiler_params=cparams,
    )
    out2d = bn_fn(x2d, w_taps, masks, scale, shift)
    return out2d.reshape(B, Cout, H, W)                                # free reshape


# ----------------------------------------------------------------- reference --
def cblr_reference(x_nchw, w_oihw, gamma, beta):
    y = lax.conv_general_dilated(x_nchw, w_oihw, (1, 1), 'SAME',
                                 dimension_numbers=('NCHW', 'OIHW', 'NCHW'))
    mean = jnp.mean(y, axis=(0, 2, 3), keepdims=True)
    var = jnp.var(y, axis=(0, 2, 3), keepdims=True)        # biased, BN training fwd
    z = ((y - mean) * lax.rsqrt(var + EPS) * gamma.reshape(1, -1, 1, 1)
         + beta.reshape(1, -1, 1, 1))
    return jnp.where(z >= 0, z, NEG_SLOPE * z)


# ---------------------------------------------------------------------- main --
if __name__ == "__main__":
    B, Cin, Cout, H, W = 2, 4, 8, 16, 16

    key = jax.random.PRNGKey(0)
    kx, kw, kg, kb = jax.random.split(key, 4)
    x = jax.random.normal(kx, (B, Cin, H, W), dtype=jnp.float32)            # NCHW
    w = 0.1 * jax.random.normal(kw, (Cout, Cin, KH, KW), dtype=jnp.float32) # OIHW
    gamma = 1.0 + 0.1 * jax.random.normal(kg, (Cout,), dtype=jnp.float32)   # BN weight
    beta = 0.1 * jax.random.normal(kb, (Cout,), dtype=jnp.float32)          # BN bias

    out = jax.block_until_ready(cblr_forward(x, w, gamma, beta))

    ref = cblr_reference(x, w, gamma, beta)
    assert out.shape == (B, Cout, H, W), out.shape
    err = float(jnp.max(jnp.abs(out - ref)))
    # bf16 MXU inputs vs f32 reference -> bf16-level tolerance
    assert err < 5e-2, f"max abs err = {err}"

    print("KERNEL_OK")
</pallas_src>

<mosaic_0001>
module attributes {stable_mosaic.version = 11 : i64} {
  func.func @_stats_kernel(%arg0: i32, %arg1: memref<1x4x256xf32, #tpu.memory_space<vmem>>, %arg2: memref<9x8x4xbf16, #tpu.memory_space<vmem>>, %arg3: memref<9x256xf32, #tpu.memory_space<vmem>>, %arg4: memref<1x8x1xf32, #tpu.memory_space<vmem>>, %arg5: memref<1x8x1xf32, #tpu.memory_space<vmem>>) attributes {dimension_semantics = [#tpu.dimension_semantics<parallel>], iteration_bounds = array<i64: 2>, scalar_prefetch = 0 : i64, scratch_operands = 0 : i64, tpu.core_type = #tpu.core_type<tc>, window_params = [{transform_indices = @transform_0, window_bounds = array<i64: 1, 4, 256>}, {pipeline_mode = #tpu.pipeline_mode<synchronous>, transform_indices = @transform_1, window_bounds = array<i64: 9, 8, 4>}, {pipeline_mode = #tpu.pipeline_mode<synchronous>, transform_indices = @transform_2, window_bounds = array<i64: 9, 256>}, {transform_indices = @transform_3, window_bounds = array<i64: 1, 8, 1>}, {transform_indices = @transform_4, window_bounds = array<i64: 1, 8, 1>}]} {
    %c0 = arith.constant 0 : index
    %c0_0 = arith.constant 0 : index
    %c0_1 = arith.constant 0 : index
    %0 = vector.load %arg1[%c0, %c0_0, %c0_1] : memref<1x4x256xf32, #tpu.memory_space<vmem>>, vector<1x4x256xf32>
    %1 = vector.shape_cast %0 : vector<1x4x256xf32> to vector<4x256xf32>
    %c0_2 = arith.constant 0 : index
    %c0_3 = arith.constant 0 : index
    %2 = vector.load %arg3[%c0_2, %c0_3] : memref<9x256xf32, #tpu.memory_space<vmem>>, vector<9x256xf32>
    %cst = arith.constant 0.000000e+00 : f32
    %3 = vector.broadcast %cst : f32 to vector<8x256xf32>
    %c17_i32 = arith.constant 17 : i32
    %4 = tpu.dynamic_rotate %1 by %c17_i32 dim 1 : vector<4x256xf32>, i32 -> vector<4x256xf32>
    %5 = vector.extract_strided_slice %2 {offsets = [0, 0], sizes = [1, 256], strides = [1, 1]} : vector<9x256xf32> to vector<1x256xf32>
    %6 = vector.broadcast %5 : vector<1x256xf32> to vector<4x256xf32>
    %7 = arith.mulf %4, %6 : vector<4x256xf32>
    %8 = arith.truncf %7 : vector<4x256xf32> to vector<4x256xbf16>
    %c0_4 = arith.constant 0 : index
    %c0_5 = arith.constant 0 : index
    %c0_6 = arith.constant 0 : index
    %9 = vector.load %arg2[%c0_4, %c0_5, %c0_6] : memref<9x8x4xbf16, #tpu.memory_space<vmem>>, vector<1x8x4xbf16>
    %10 = vector.shape_cast %9 : vector<1x8x4xbf16> to vector<8x4xbf16>
    %cst_7 = arith.constant dense<0.000000e+00> : vector<8x256xf32>
    %11 = tpu.matmul %10, %8, %cst_7 {dimension_numbers = #tpu.dot_dimension_numbers<[1], [0], [0], [1], [0, 0, 1, 1], [], []>} : vector<8x4xbf16>, vector<4x256xbf16>, vector<8x256xf32> -> vector<8x256xf32>
    %12 = arith.addf %3, %11 : vector<8x256xf32>
    %c16_i32 = arith.constant 16 : i32
    %13 = tpu.dynamic_rotate %1 by %c16_i32 dim 1 : vector<4x256xf32>, i32 -> vector<4x256xf32>
    %14 = vector.extract_strided_slice %2 {offsets = [1, 0], sizes = [1, 256], strides = [1, 1]} : vector<9x256xf32> to vector<1x256xf32>
    %15 = vector.broadcast %14 : vector<1x256xf32> to vector<4x256xf32>
    %16 = arith.mulf %13, %15 : vector<4x256xf32>
    %17 = arith.truncf %16 : vector<4x256xf32> to vector<4x256xbf16>
    %c1 = arith.constant 1 : index
    %c0_8 = arith.constant 0 : index
    %c0_9 = arith.constant 0 : index
    %18 = vector.load %arg2[%c1, %c0_8, %c0_9] : memref<9x8x4xbf16, #tpu.memory_space<vmem>>, vector<1x8x4xbf16>
    %19 = vector.shape_cast %18 : vector<1x8x4xbf16> to vector<8x4xbf16>
    %cst_10 = arith.constant dense<0.000000e+00> : vector<8x256xf32>
    %20 = tpu.matmul %19, %17, %cst_10 {dimension_numbers = #tpu.dot_dimension_numbers<[1], [0], [0], [1], [0, 0, 1, 1], [], []>} : vector<8x4xbf16>, vector<4x256xbf16>, vector<8x256xf32> -> vector<8x256xf32>
    %21 = arith.addf %12, %20 : vector<8x256xf32>
    %c15_i32 = arith.constant 15 : i32
    %22 = tpu.dynamic_rotate %1 by %c15_i32 dim 1 : vector<4x256xf32>, i32 -> vector<4x256xf32>
    %23 = vector.extract_strided_slice %2 {offsets = [2, 0], sizes = [1, 256], strides = [1, 1]} : vector<9x256xf32> to vector<1x256xf32>
    %24 = vector.broadcast %23 : vector<1x256xf32> to vector<4x256xf32>
    %25 = arith.mulf %22, %24 : vector<4x256xf32>
    %26 = arith.truncf %25 : vector<4x256xf32> to vector<4x256xbf16>
    %c2 = arith.constant 2 : index
    %c0_11 = arith.constant 0 : index
    %c0_12 = arith.constant 0 : index
    %27 = vector.load %arg2[%c2, %c0_11, %c0_12] : memref<9x8x4xbf16, #tpu.memory_space<vmem>>, vector<1x8x4xbf16>
    %28 = vector.shape_cast %27 : vector<1x8x4xbf16> to vector<8x4xbf16>
    %cst_13 = arith.constant dense<0.000000e+00> : vector<8x256xf32>
    %29 = tpu.matmul %28, %26, %cst_13 {dimension_numbers = #tpu.dot_dimension_numbers<[1], [0], [0], [1], [0, 0, 1, 1], [], []>} : vector<8x4xbf16>, vector<4x256xbf16>, vector<8x256xf32> -> vector<8x256xf32>
    %30 = arith.addf %21, %29 : vector<8x256xf32>
    %c1_i32 = arith.constant 1 : i32
    %31 = tpu.dynamic_rotate %1 by %c1_i32 dim 1 : vector<4x256xf32>, i32 -> vector<4x256xf32>
    %32 = vector.extract_strided_slice %2 {offsets = [3, 0], sizes = [1, 256], strides = [1, 1]} : vector<9x256xf32> to vector<1x256xf32>
    %33 = vector.broadcast %32 : vector<1x256xf32> to vector<4x256xf32>
    %34 = arith.mulf %31, %33 : vector<4x256xf32>
    %35 = arith.truncf %34 : vector<4x256xf32> to vector<4x256xbf16>
    %c3 = arith.constant 3 : index
    %c0_14 = arith.constant 0 : index
    %c0_15 = arith.constant 0 : index
    %36 = vector.load %arg2[%c3, %c0_14, %c0_15] : memref<9x8x4xbf16, #tpu.memory_space<vmem>>, vector<1x8x4xbf16>
    %37 = vector.shape_cast %36 : vector<1x8x4xbf16> to vector<8x4xbf16>
    %cst_16 = arith.constant dense<0.000000e+00> : vector<8x256xf32>
    %38 = tpu.matmul %37, %35, %cst_16 {dimension_numbers = #tpu.dot_dimension_numbers<[1], [0], [0], [1], [0, 0, 1, 1], [], []>} : vector<8x4xbf16>, vector<4x256xbf16>, vector<8x256xf32> -> vector<8x256xf32>
    %39 = arith.addf %30, %38 : vector<8x256xf32>
    %40 = arith.truncf %1 : vector<4x256xf32> to vector<4x256xbf16>
    %c4 = arith.constant 4 : index
    %c0_17 = arith.constant 0 : index
    %c0_18 = arith.constant 0 : index
    %41 = vector.load %arg2[%c4, %c0_17, %c0_18] : memref<9x8x4xbf16, #tpu.memory_space<vmem>>, vector<1x8x4xbf16>
    %42 = vector.shape_cast %41 : vector<1x8x4xbf16> to vector<8x4xbf16>
    %cst_19 = arith.constant dense<0.000000e+00> : vector<8x256xf32>
    %43 = tpu.matmul %42, %40, %cst_19 {dimension_numbers = #tpu.dot_dimension_numbers<[1], [0], [0], [1], [0, 0, 1, 1], [], []>} : vector<8x4xbf16>, vector<4x256xbf16>, vector<8x256xf32> -> vector<8x256xf32>
    %44 = arith.addf %39, %43 : vector<8x256xf32>
    %c255_i32 = arith.constant 255 : i32
    %45 = tpu.dynamic_rotate %1 by %c255_i32 dim 1 : vector<4x256xf32>, i32 -> vector<4x256xf32>
    %46 = vector.extract_strided_slice %2 {offsets = [5, 0], sizes = [1, 256], strides = [1, 1]} : vector<9x256xf32> to vector<1x256xf32>
    %47 = vector.broadcast %46 : vector<1x256xf32> to vector<4x256xf32>
    %48 = arith.mulf %45, %47 : vector<4x256xf32>
    %49 = arith.truncf %48 : vector<4x256xf32> to vector<4x256xbf16>
    %c5 = arith.constant 5 : index
    %c0_20 = arith.constant 0 : index
    %c0_21 = arith.constant 0 : index
    %50 = vector.load %arg2[%c5, %c0_20, %c0_21] : memref<9x8x4xbf16, #tpu.memory_space<vmem>>, vector<1x8x4xbf16>
    %51 = vector.shape_cast %50 : vector<1x8x4xbf16> to vector<8x4xbf16>
    %cst_22 = arith.constant dense<0.000000e+00> : vector<8x256xf32>
    %52 = tpu.matmul %51, %49, %cst_22 {dimension_numbers = #tpu.dot_dimension_numbers<[1], [0], [0], [1], [0, 0, 1, 1], [], []>} : vector<8x4xbf16>, vector<4x256xbf16>, vector<8x256xf32> -> vector<8x256xf32>
    %53 = arith.addf %44, %52 : vector<8x256xf32>
    %c241_i32 = arith.constant 241 : i32
    %54 = tpu.dynamic_rotate %1 by %c241_i32 dim 1 : vector<4x256xf32>, i32 -> vector<4x256xf32>
    %55 = vector.extract_strided_slice %2 {offsets = [6, 0], sizes = [1, 256], strides = [1, 1]} : vector<9x256xf32> to vector<1x256xf32>
    %56 = vector.broadcast %55 : vector<1x256xf32> to vector<4x256xf32>
    %57 = arith.mulf %54, %56 : vector<4x256xf32>
    %58 = arith.truncf %57 : vector<4x256xf32> to vector<4x256xbf16>
    %c6 = arith.constant 6 : index
    %c0_23 = arith.constant 0 : index
    %c0_24 = arith.constant 0 : index
    %59 = vector.load %arg2[%c6, %c0_23, %c0_24] : memref<9x8x4xbf16, #tpu.memory_space<vmem>>, vector<1x8x4xbf16>
    %60 = vector.shape_cast %59 : vector<1x8x4xbf16> to vector<8x4xbf16>
    %cst_25 = arith.constant dense<0.000000e+00> : vector<8x256xf32>
    %61 = tpu.matmul %60, %58, %cst_25 {dimension_numbers = #tpu.dot_dimension_numbers<[1], [0], [0], [1], [0, 0, 1, 1], [], []>} : vector<8x4xbf16>, vector<4x256xbf16>, vector<8x256xf32> -> vector<8x256xf32>
    %62 = arith.addf %53, %61 : vector<8x256xf32>
    %c240_i32 = arith.constant 240 : i32
    %63 = tpu.dynamic_rotate %1 by %c240_i32 dim 1 : vector<4x256xf32>, i32 -> vector<4x256xf32>
    %64 = vector.extract_strided_slice %2 {offsets = [7, 0], sizes = [1, 256], strides = [1, 1]} : vector<9x256xf32> to vector<1x256xf32>
    %65 = vector.broadcast %64 : vector<1x256xf32> to vector<4x256xf32>
    %66 = arith.mulf %63, %65 : vector<4x256xf32>
    %67 = arith.truncf %66 : vector<4x256xf32> to vector<4x256xbf16>
    %c7 = arith.constant 7 : index
    %c0_26 = arith.constant 0 : index
    %c0_27 = arith.constant 0 : index
    %68 = vector.load %arg2[%c7, %c0_26, %c0_27] : memref<9x8x4xbf16, #tpu.memory_space<vmem>>, vector<1x8x4xbf16>
    %69 = vector.shape_cast %68 : vector<1x8x4xbf16> to vector<8x4xbf16>
    %cst_28 = arith.constant dense<0.000000e+00> : vector<8x256xf32>
    %70 = tpu.matmul %69, %67, %cst_28 {dimension_numbers = #tpu.dot_dimension_numbers<[1], [0], [0], [1], [0, 0, 1, 1], [], []>} : vector<8x4xbf16>, vector<4x256xbf16>, vector<8x256xf32> -> vector<8x256xf32>
    %71 = arith.addf %62, %70 : vector<8x256xf32>
    %c239_i32 = arith.constant 239 : i32
    %72 = tpu.dynamic_rotate %1 by %c239_i32 dim 1 : vector<4x256xf32>, i32 -> vector<4x256xf32>
    %73 = vector.extract_strided_slice %2 {offsets = [8, 0], sizes = [1, 256], strides = [1, 1]} : vector<9x256xf32> to vector<1x256xf32>
    %74 = vector.broadcast %73 : vector<1x256xf32> to vector<4x256xf32>
    %75 = arith.mulf %72, %74 : vector<4x256xf32>
    %76 = arith.truncf %75 : vector<4x256xf32> to vector<4x256xbf16>
    %c8 = arith.constant 8 : index
    %c0_29 = arith.constant 0 : index
    %c0_30 = arith.constant 0 : index
    %77 = vector.load %arg2[%c8, %c0_29, %c0_30] : memref<9x8x4xbf16, #tpu.memory_space<vmem>>, vector<1x8x4xbf16>
    %78 = vector.shape_cast %77 : vector<1x8x4xbf16> to vector<8x4xbf16>
    %cst_31 = arith.constant dense<0.000000e+00> : vector<8x256xf32>
    %79 = tpu.matmul %78, %76, %cst_31 {dimension_numbers = #tpu.dot_dimension_numbers<[1], [0], [0], [1], [0, 0, 1, 1], [], []>} : vector<8x4xbf16>, vector<4x256xbf16>, vector<8x256xf32> -> vector<8x256xf32>
    %80 = arith.addf %71, %79 : vector<8x256xf32>
    %cst_32 = arith.constant dense<0.000000e+00> : vector<8xf32>
    %81 = vector.multi_reduction <add>, %80, %cst_32 [1] : vector<8x256xf32> to vector<8xf32>
    %82 = vector.shape_cast %81 : vector<8xf32> to vector<8x1xf32>
    %cst_33 = arith.constant 3.906250e-03 : f32
    %83 = vector.broadcast %cst_33 : f32 to vector<8x1xf32>
    %84 = arith.mulf %82, %83 : vector<8x1xf32>
    %85 = vector.broadcast %84 : vector<8x1xf32> to vector<8x256xf32>
    %86 = arith.subf %80, %85 : vector<8x256xf32>
    %c0_34 = arith.constant 0 : index
    %c0_35 = arith.constant 0 : index
    %c0_36 = arith.constant 0 : index
    %87 = vector.load %arg4[%c0_34, %c0_35, %c0_36] : memref<1x8x1xf32, #tpu.memory_space<vmem>>, vector<1x8x1xf32>
    %88 = vector.shape_cast %87 : vector<1x8x1xf32> to vector<8x1xf32>
    %89 = vector.shape_cast %82 : vector<8x1xf32> to vector<1x8x1xf32>
    tpu.vector_store %arg4[%c0_34, %c0_35, %c0_36], %89 {strides = array<i32>} : memref<1x8x1xf32, #tpu.memory_space<vmem>>, vector<1x8x1xf32>,
    %90 = arith.mulf %86, %86 : vector<8x256xf32>
    %cst_37 = arith.constant dense<0.000000e+00> : vector<8xf32>
    %91 = vector.multi_reduction <add>, %90, %cst_37 [1] : vector<8x256xf32> to vector<8xf32>
    %92 = vector.shape_cast %91 : vector<8xf32> to vector<8x1xf32>
    %c0_38 = arith.constant 0 : index
    %c0_39 = arith.constant 0 : index
    %c0_40 = arith.constant 0 : index
    %93 = vector.load %arg5[%c0_38, %c0_39, %c0_40] : memref<1x8x1xf32, #tpu.memory_space<vmem>>, vector<1x8x1xf32>
    %94 = vector.shape_cast %93 : vector<1x8x1xf32> to vector<8x1xf32>
    %95 = vector.shape_cast %92 : vector<8x1xf32> to vector<1x8x1xf32>
    tpu.vector_store %arg5[%c0_38, %c0_39, %c0_40], %95 {strides = array<i32>} : memref<1x8x1xf32, #tpu.memory_space<vmem>>, vector<1x8x1xf32>,
    return
  }
  func.func @transform_0(%arg0: i32) -> (i32, i32, i32) {
    %c0_i32 = arith.constant 0 : i32
    %c0_i32_0 = arith.constant 0 : i32
    %c0_i32_1 = arith.constant 0 : i32
    return %arg0, %c0_i32, %c0_i32_0 : i32, i32, i32
  }
  func.func @transform_1(%arg0: i32) -> (i32, i32, i32) {
    %c0_i32 = arith.constant 0 : i32
    %c0_i32_0 = arith.constant 0 : i32
    %c0_i32_1 = arith.constant 0 : i32
    %c0_i32_2 = arith.constant 0 : i32
    return %c0_i32, %c0_i32_0, %c0_i32_1 : i32, i32, i32
  }
  func.func @transform_2(%arg0: i32) -> (i32, i32) {
    %c0_i32 = arith.constant 0 : i32
    %c0_i32_0 = arith.constant 0 : i32
    %c0_i32_1 = arith.constant 0 : i32
    return %c0_i32, %c0_i32_0 : i32, i32
  }
  func.func @transform_3(%arg0: i32) -> (i32, i32, i32) {
    %c0_i32 = arith.constant 0 : i32
    %c0_i32_0 = arith.constant 0 : i32
    %c0_i32_1 = arith.constant 0 : i32
    return %arg0, %c0_i32, %c0_i32_0 : i32, i32, i32
  }
  func.func @transform_4(%arg0: i32) -> (i32, i32, i32) {
    %c0_i32 = arith.constant 0 : i32
    %c0_i32_0 = arith.constant 0 : i32
    %c0_i32_1 = arith.constant 0 : i32
    return %arg0, %c0_i32, %c0_i32_0 : i32, i32, i32
  }
}

module attributes {stable_mosaic.version = 11 : i64} {
  func.func @_conv_bn_lrelu_kernel(%arg0: i32, %arg1: memref<1x4x256xf32, #tpu.memory_space<vmem>>, %arg2: memref<9x8x4xbf16, #tpu.memory_space<vmem>>, %arg3: memref<9x256xf32, #tpu.memory_space<vmem>>, %arg4: memref<8x1xf32, #tpu.memory_space<vmem>>, %arg5: memref<8x1xf32, #tpu.memory_space<vmem>>, %arg6: memref<1x8x256xf32, #tpu.memory_space<vmem>>) attributes {dimension_semantics = [#tpu.dimension_semantics<parallel>], iteration_bounds = array<i64: 2>, scalar_prefetch = 0 : i64, scratch_operands = 0 : i64, tpu.core_type = #tpu.core_type<tc>, window_params = [{transform_indices = @transform_0, window_bounds = array<i64: 1, 4, 256>}, {pipeline_mode = #tpu.pipeline_mode<synchronous>, transform_indices = @transform_1, window_bounds = array<i64: 9, 8, 4>}, {pipeline_mode = #tpu.pipeline_mode<synchronous>, transform_indices = @transform_2, window_bounds = array<i64: 9, 256>}, {pipeline_mode = #tpu.pipeline_mode<synchronous>, transform_indices = @transform_3, window_bounds = array<i64: 8, 1>}, {pipeline_mode = #tpu.pipeline_mode<synchronous>, transform_indices = @transform_4, window_bounds = array<i64: 8, 1>}, {transform_indices = @transform_5, window_bounds = array<i64: 1, 8, 256>}]} {
    %c0 = arith.constant 0 : index
    %c0_0 = arith.constant 0 : index
    %c0_1 = arith.constant 0 : index
    %0 = vector.load %arg1[%c0, %c0_0, %c0_1] : memref<1x4x256xf32, #tpu.memory_space<vmem>>, vector<1x4x256xf32>
    %1 = vector.shape_cast %0 : vector<1x4x256xf32> to vector<4x256xf32>
    %c0_2 = arith.constant 0 : index
    %c0_3 = arith.constant 0 : index
    %2 = vector.load %arg3[%c0_2, %c0_3] : memref<9x256xf32, #tpu.memory_space<vmem>>, vector<9x256xf32>
    %cst = arith.constant 0.000000e+00 : f32
    %3 = vector.broadcast %cst : f32 to vector<8x256xf32>
    %c17_i32 = arith.constant 17 : i32
    %4 = tpu.dynamic_rotate %1 by %c17_i32 dim 1 : vector<4x256xf32>, i32 -> vector<4x256xf32>
    %5 = vector.extract_strided_slice %2 {offsets = [0, 0], sizes = [1, 256], strides = [1, 1]} : vector<9x256xf32> to vector<1x256xf32>
    %6 = vector.broadcast %5 : vector<1x256xf32> to vector<4x256xf32>
    %7 = arith.mulf %4, %6 : vector<4x256xf32>
    %8 = arith.truncf %7 : vector<4x256xf32> to vector<4x256xbf16>
    %c0_4 = arith.constant 0 : index
    %c0_5 = arith.constant 0 : index
    %c0_6 = arith.constant 0 : index
    %9 = vector.load %arg2[%c0_4, %c0_5, %c0_6] : memref<9x8x4xbf16, #tpu.memory_space<vmem>>, vector<1x8x4xbf16>
    %10 = vector.shape_cast %9 : vector<1x8x4xbf16> to vector<8x4xbf16>
    %cst_7 = arith.constant dense<0.000000e+00> : vector<8x256xf32>
    %11 = tpu.matmul %10, %8, %cst_7 {dimension_numbers = #tpu.dot_dimension_numbers<[1], [0], [0], [1], [0, 0, 1, 1], [], []>} : vector<8x4xbf16>, vector<4x256xbf16>, vector<8x256xf32> -> vector<8x256xf32>
    %12 = arith.addf %3, %11 : vector<8x256xf32>
    %c16_i32 = arith.constant 16 : i32
    %13 = tpu.dynamic_rotate %1 by %c16_i32 dim 1 : vector<4x256xf32>, i32 -> vector<4x256xf32>
    %14 = vector.extract_strided_slice %2 {offsets = [1, 0], sizes = [1, 256], strides = [1, 1]} : vector<9x256xf32> to vector<1x256xf32>
    %15 = vector.broadcast %14 : vector<1x256xf32> to vector<4x256xf32>
    %16 = arith.mulf %13, %15 : vector<4x256xf32>
    %17 = arith.truncf %16 : vector<4x256xf32> to vector<4x256xbf16>
    %c1 = arith.constant 1 : index
    %c0_8 = arith.constant 0 : index
    %c0_9 = arith.constant 0 : index
    %18 = vector.load %arg2[%c1, %c0_8, %c0_9] : memref<9x8x4xbf16, #tpu.memory_space<vmem>>, vector<1x8x4xbf16>
    %19 = vector.shape_cast %18 : vector<1x8x4xbf16> to vector<8x4xbf16>
    %cst_10 = arith.constant dense<0.000000e+00> : vector<8x256xf32>
    %20 = tpu.matmul %19, %17, %cst_10 {dimension_numbers = #tpu.dot_dimension_numbers<[1], [0], [0], [1], [0, 0, 1, 1], [], []>} : vector<8x4xbf16>, vector<4x256xbf16>, vector<8x256xf32> -> vector<8x256xf32>
    %21 = arith.addf %12, %20 : vector<8x256xf32>
    %c15_i32 = arith.constant 15 : i32
    %22 = tpu.dynamic_rotate %1 by %c15_i32 dim 1 : vector<4x256xf32>, i32 -> vector<4x256xf32>
    %23 = vector.extract_strided_slice %2 {offsets = [2, 0], sizes = [1, 256], strides = [1, 1]} : vector<9x256xf32> to vector<1x256xf32>
    %24 = vector.broadcast %23 : vector<1x256xf32> to vector<4x256xf32>
    %25 = arith.mulf %22, %24 : vector<4x256xf32>
    %26 = arith.truncf %25 : vector<4x256xf32> to vector<4x256xbf16>
    %c2 = arith.constant 2 : index
    %c0_11 = arith.constant 0 : index
    %c0_12 = arith.constant 0 : index
    %27 = vector.load %arg2[%c2, %c0_11, %c0_12] : memref<9x8x4xbf16, #tpu.memory_space<vmem>>, vector<1x8x4xbf16>
    %28 = vector.shape_cast %27 : vector<1x8x4xbf16> to vector<8x4xbf16>
    %cst_13 = arith.constant dense<0.000000e+00> : vector<8x256xf32>
    %29 = tpu.matmul %28, %26, %cst_13 {dimension_numbers = #tpu.dot_dimension_numbers<[1], [0], [0], [1], [0, 0, 1, 1], [], []>} : vector<8x4xbf16>, vector<4x256xbf16>, vector<8x256xf32> -> vector<8x256xf32>
    %30 = arith.addf %21, %29 : vector<8x256xf32>
    %c1_i32 = arith.constant 1 : i32
    %31 = tpu.dynamic_rotate %1 by %c1_i32 dim 1 : vector<4x256xf32>, i32 -> vector<4x256xf32>
    %32 = vector.extract_strided_slice %2 {offsets = [3, 0], sizes = [1, 256], strides = [1, 1]} : vector<9x256xf32> to vector<1x256xf32>
    %33 = vector.broadcast %32 : vector<1x256xf32> to vector<4x256xf32>
    %34 = arith.mulf %31, %33 : vector<4x256xf32>
    %35 = arith.truncf %34 : vector<4x256xf32> to vector<4x256xbf16>
    %c3 = arith.constant 3 : index
    %c0_14 = arith.constant 0 : index
    %c0_15 = arith.constant 0 : index
    %36 = vector.load %arg2[%c3, %c0_14, %c0_15] : memref<9x8x4xbf16, #tpu.memory_space<vmem>>, vector<1x8x4xbf16>
    %37 = vector.shape_cast %36 : vector<1x8x4xbf16> to vector<8x4xbf16>
    %cst_16 = arith.constant dense<0.000000e+00> : vector<8x256xf32>
    %38 = tpu.matmul %37, %35, %cst_16 {dimension_numbers = #tpu.dot_dimension_numbers<[1], [0], [0], [1], [0, 0, 1, 1], [], []>} : vector<8x4xbf16>, vector<4x256xbf16>, vector<8x256xf32> -> vector<8x256xf32>
    %39 = arith.addf %30, %38 : vector<8x256xf32>
    %40 = arith.truncf %1 : vector<4x256xf32> to vector<4x256xbf16>
    %c4 = arith.constant 4 : index
    %c0_17 = arith.constant 0 : index
    %c0_18 = arith.constant 0 : index
    %41 = vector.load %arg2[%c4, %c0_17, %c0_18] : memref<9x8x4xbf16, #tpu.memory_space<vmem>>, vector<1x8x4xbf16>
    %42 = vector.shape_cast %41 : vector<1x8x4xbf16> to vector<8x4xbf16>
    %cst_19 = arith.constant dense<0.000000e+00> : vector<8x256xf32>
    %43 = tpu.matmul %42, %40, %cst_19 {dimension_numbers = #tpu.dot_dimension_numbers<[1], [0], [0], [1], [0, 0, 1, 1], [], []>} : vector<8x4xbf16>, vector<4x256xbf16>, vector<8x256xf32> -> vector<8x256xf32>
    %44 = arith.addf %39, %43 : vector<8x256xf32>
    %c255_i32 = arith.constant 255 : i32
    %45 = tpu.dynamic_rotate %1 by %c255_i32 dim 1 : vector<4x256xf32>, i32 -> vector<4x256xf32>
    %46 = vector.extract_strided_slice %2 {offsets = [5, 0], sizes = [1, 256], strides = [1, 1]} : vector<9x256xf32> to vector<1x256xf32>
    %47 = vector.broadcast %46 : vector<1x256xf32> to vector<4x256xf32>
    %48 = arith.mulf %45, %47 : vector<4x256xf32>
    %49 = arith.truncf %48 : vector<4x256xf32> to vector<4x256xbf16>
    %c5 = arith.constant 5 : index
    %c0_20 = arith.constant 0 : index
    %c0_21 = arith.constant 0 : index
    %50 = vector.load %arg2[%c5, %c0_20, %c0_21] : memref<9x8x4xbf16, #tpu.memory_space<vmem>>, vector<1x8x4xbf16>
    %51 = vector.shape_cast %50 : vector<1x8x4xbf16> to vector<8x4xbf16>
    %cst_22 = arith.constant dense<0.000000e+00> : vector<8x256xf32>
    %52 = tpu.matmul %51, %49, %cst_22 {dimension_numbers = #tpu.dot_dimension_numbers<[1], [0], [0], [1], [0, 0, 1, 1], [], []>} : vector<8x4xbf16>, vector<4x256xbf16>, vector<8x256xf32> -> vector<8x256xf32>
    %53 = arith.addf %44, %52 : vector<8x256xf32>
    %c241_i32 = arith.constant 241 : i32
    %54 = tpu.dynamic_rotate %1 by %c241_i32 dim 1 : vector<4x256xf32>, i32 -> vector<4x256xf32>
    %55 = vector.extract_strided_slice %2 {offsets = [6, 0], sizes = [1, 256], strides = [1, 1]} : vector<9x256xf32> to vector<1x256xf32>
    %56 = vector.broadcast %55 : vector<1x256xf32> to vector<4x256xf32>
    %57 = arith.mulf %54, %56 : vector<4x256xf32>
    %58 = arith.truncf %57 : vector<4x256xf32> to vector<4x256xbf16>
    %c6 = arith.constant 6 : index
    %c0_23 = arith.constant 0 : index
    %c0_24 = arith.constant 0 : index
    %59 = vector.load %arg2[%c6, %c0_23, %c0_24] : memref<9x8x4xbf16, #tpu.memory_space<vmem>>, vector<1x8x4xbf16>
    %60 = vector.shape_cast %59 : vector<1x8x4xbf16> to vector<8x4xbf16>
    %cst_25 = arith.constant dense<0.000000e+00> : vector<8x256xf32>
    %61 = tpu.matmul %60, %58, %cst_25 {dimension_numbers = #tpu.dot_dimension_numbers<[1], [0], [0], [1], [0, 0, 1, 1], [], []>} : vector<8x4xbf16>, vector<4x256xbf16>, vector<8x256xf32> -> vector<8x256xf32>
    %62 = arith.addf %53, %61 : vector<8x256xf32>
    %c240_i32 = arith.constant 240 : i32
    %63 = tpu.dynamic_rotate %1 by %c240_i32 dim 1 : vector<4x256xf32>, i32 -> vector<4x256xf32>
    %64 = vector.extract_strided_slice %2 {offsets = [7, 0], sizes = [1, 256], strides = [1, 1]} : vector<9x256xf32> to vector<1x256xf32>
    %65 = vector.broadcast %64 : vector<1x256xf32> to vector<4x256xf32>
    %66 = arith.mulf %63, %65 : vector<4x256xf32>
    %67 = arith.truncf %66 : vector<4x256xf32> to vector<4x256xbf16>
    %c7 = arith.constant 7 : index
    %c0_26 = arith.constant 0 : index
    %c0_27 = arith.constant 0 : index
    %68 = vector.load %arg2[%c7, %c0_26, %c0_27] : memref<9x8x4xbf16, #tpu.memory_space<vmem>>, vector<1x8x4xbf16>
    %69 = vector.shape_cast %68 : vector<1x8x4xbf16> to vector<8x4xbf16>
    %cst_28 = arith.constant dense<0.000000e+00> : vector<8x256xf32>
    %70 = tpu.matmul %69, %67, %cst_28 {dimension_numbers = #tpu.dot_dimension_numbers<[1], [0], [0], [1], [0, 0, 1, 1], [], []>} : vector<8x4xbf16>, vector<4x256xbf16>, vector<8x256xf32> -> vector<8x256xf32>
    %71 = arith.addf %62, %70 : vector<8x256xf32>
    %c239_i32 = arith.constant 239 : i32
    %72 = tpu.dynamic_rotate %1 by %c239_i32 dim 1 : vector<4x256xf32>, i32 -> vector<4x256xf32>
    %73 = vector.extract_strided_slice %2 {offsets = [8, 0], sizes = [1, 256], strides = [1, 1]} : vector<9x256xf32> to vector<1x256xf32>
    %74 = vector.broadcast %73 : vector<1x256xf32> to vector<4x256xf32>
    %75 = arith.mulf %72, %74 : vector<4x256xf32>
    %76 = arith.truncf %75 : vector<4x256xf32> to vector<4x256xbf16>
    %c8 = arith.constant 8 : index
    %c0_29 = arith.constant 0 : index
    %c0_30 = arith.constant 0 : index
    %77 = vector.load %arg2[%c8, %c0_29, %c0_30] : memref<9x8x4xbf16, #tpu.memory_space<vmem>>, vector<1x8x4xbf16>
    %78 = vector.shape_cast %77 : vector<1x8x4xbf16> to vector<8x4xbf16>
    %cst_31 = arith.constant dense<0.000000e+00> : vector<8x256xf32>
    %79 = tpu.matmul %78, %76, %cst_31 {dimension_numbers = #tpu.dot_dimension_numbers<[1], [0], [0], [1], [0, 0, 1, 1], [], []>} : vector<8x4xbf16>, vector<4x256xbf16>, vector<8x256xf32> -> vector<8x256xf32>
    %80 = arith.addf %71, %79 : vector<8x256xf32>
    %c0_32 = arith.constant 0 : index
    %c0_33 = arith.constant 0 : index
    %81 = vector.load %arg4[%c0_32, %c0_33] : memref<8x1xf32, #tpu.memory_space<vmem>>, vector<8x1xf32>
    %82 = vector.broadcast %81 : vector<8x1xf32> to vector<8x256xf32>
    %83 = arith.mulf %80, %82 : vector<8x256xf32>
    %c0_34 = arith.constant 0 : index
    %c0_35 = arith.constant 0 : index
    %84 = vector.load %arg5[%c0_34, %c0_35] : memref<8x1xf32, #tpu.memory_space<vmem>>, vector<8x1xf32>
    %85 = vector.broadcast %84 : vector<8x1xf32> to vector<8x256xf32>
    %86 = arith.addf %83, %85 : vector<8x256xf32>
    %cst_36 = arith.constant 0.000000e+00 : f32
    %87 = vector.broadcast %cst_36 : f32 to vector<8x256xf32>
    %88 = arith.cmpf oge, %86, %87 : vector<8x256xf32>
    %cst_37 = arith.constant 0.00999999977 : f32
    %89 = vector.broadcast %cst_37 : f32 to vector<8x256xf32>
    %90 = arith.mulf %89, %86 : vector<8x256xf32>
    %91 = arith.select %88, %86, %90 : vector<8x256xi1>, vector<8x256xf32>
    %c0_38 = arith.constant 0 : index
    %c0_39 = arith.constant 0 : index
    %c0_40 = arith.constant 0 : index
    %92 = vector.load %arg6[%c0_38, %c0_39, %c0_40] : memref<1x8x256xf32, #tpu.memory_space<vmem>>, vector<1x8x256xf32>
    %93 = vector.shape_cast %92 : vector<1x8x256xf32> to vector<8x256xf32>
    %94 = vector.shape_cast %91 : vector<8x256xf32> to vector<1x8x256xf32>
    tpu.vector_store %arg6[%c0_38, %c0_39, %c0_40], %94 {strides = array<i32>} : memref<1x8x256xf32, #tpu.memory_space<vmem>>, vector<1x8x256xf32>,
    return
  }
  func.func @transform_0(%arg0: i32) -> (i32, i32, i32) {
    %c0_i32 = arith.constant 0 : i32
    %c0_i32_0 = arith.constant 0 : i32
    %c0_i32_1 = arith.constant 0 : i32
    return %arg0, %c0_i32, %c0_i32_0 : i32, i32, i32
  }
  func.func @transform_1(%arg0: i32) -> (i32, i32, i32) {
    %c0_i32 = arith.constant 0 : i32
    %c0_i32_0 = arith.constant 0 : i32
    %c0_i32_1 = arith.constant 0 : i32
    %c0_i32_2 = arith.constant 0 : i32
    return %c0_i32, %c0_i32_0, %c0_i32_1 : i32, i32, i32
  }
  func.func @transform_2(%arg0: i32) -> (i32, i32) {
    %c0_i32 = arith.constant 0 : i32
    %c0_i32_0 = arith.constant 0 : i32
    %c0_i32_1 = arith.constant 0 : i32
    return %c0_i32, %c0_i32_0 : i32, i32
  }
  func.func @transform_3(%arg0: i32) -> (i32, i32) {
    %c0_i32 = arith.constant 0 : i32
    %c0_i32_0 = arith.constant 0 : i32
    %c0_i32_1 = arith.constant 0 : i32
    return %c0_i32, %c0_i32_0 : i32, i32
  }
  func.func @transform_4(%arg0: i32) -> (i32, i32) {
    %c0_i32 = arith.constant 0 : i32
    %c0_i32_0 = arith.constant 0 : i32
    %c0_i32_1 = arith.constant 0 : i32
    return %c0_i32, %c0_i32_0 : i32, i32
  }
  func.func @transform_5(%arg0: i32) -> (i32, i32, i32) {
    %c0_i32 = arith.constant 0 : i32
    %c0_i32_0 = arith.constant 0 : i32
    %c0_i32_1 = arith.constant 0 : i32
    return %arg0, %c0_i32, %c0_i32_0 : i32, i32, i32
  }
}

</mosaic_0001>

<bundles_post_ra>
// kernel: cblr_forward.2
= control target key start
LH: loop header
LB: loop body
LE: loop exit
PB: predicated region body
PF: predicated region fallthrough
CT: control target
= control target key end

     0   :  { %s910_s15 = smov 0   ;;  %s1046_s0 = inlined_call_operand.vmem [shape: f32[2,4,256], index: 0, kind: input, shape index: {}]   ;;  %s1047_s1 = inlined_call_operand.vmem [shape: bf16[9,8,4], index: 1, kind: input, shape index: {}]   ;;  %s1048_s2 = inlined_call_operand.vmem [shape: f32[9,256], index: 2, kind: input, shape index: {}]   ;;  %s1049_s3 = inlined_call_operand.vmem [shape: f32[2,8,1], index: 3, kind: output, shape index: {0}]   ;;  %s1050_s4 = inlined_call_operand.vmem [shape: f32[2,8,1], index: 4, kind: output, shape index: {1}]  }
   0x1 LB: > { %s813_s16 = sadd.s32 4294967295, %s875_s15   ;;  %p817_p0 = scmp.ge.s32.totalorder %s875_s15, 1  ;;  %s875_s15 = sphi %s910_s15, %s15_s15  }
   0x2   : > { %p165_p1 = scmp.lt.s32.totalorder %s875_s15, 3 }
   0x4   : > { %p166_p2 = pnand %p817_p0, %p165_p1 }
   0x5   : > { %p194_p3 = scmp.lt.s32.totalorder (!%p166_p2), %s813_s16, 1  ;;  %s877_s21 = smov (!%p166_p2), 17  }
   0x6   : > { %169 = sbr.rel (%p166_p2) target bundleno = 598 (0x256), region = 32  ;;  %s878_s22 = smov (!%p166_p2), 16  }
   0x7   : > { %s879_s23 = smov (!%p166_p2), 15   ;;  %s880_s24 = smov (!%p166_p2), 1  }
   0x8   : > { %s881_s25 = smov (!%p166_p2), 127   ;;  %s882_s26 = smov (!%p166_p2), 113  }
   0x9   : > { %s883_s27 = smov (!%p166_p2), 112   ;;  %s884_s28 = smov (!%p166_p2), 111  }
   0xb   : > { %s1052_s16 = smov (!%p194_p3, %s813_s16), 1  ;;  %v223_v20 = vlaneseq  ;;  %v933_v23 = vld [vmem:[%s1048_s2] sm:$0xff]  ;;  %v938_v24 = vld [vmem:[%s1048_s2 + $0x8] sm:$0xff]  ;;  %vm259_vm2 = vcmask 1041408   ;;  %vm255_vm4 = vcmask 31744   ;;  %vm721_vm10 = vcmask 7168  }
   0xc   : > { %s918_s17 = sshll.u32 %s1052_s16, 3  ;;  %v228_v25 = vperm.slane %v933_v23, 0  ;;  %v229_v26 = vperm.slane %v938_v24, 0  ;;  %v339_v32 = vperm.slane %v933_v23, 2  ;;  %v340_v33 = vperm.slane %v938_v24, 2 }
   0xd   : > { %s198_s20 = scalar_lea.vmem %s1046_s0, %s918_s17  ;;  %v928_v22 = vand.u32 127, %v223_v20  ;;  %v247_v44 = vperm.slane %v933_v23, 1  ;;  %v248_v45 = vperm.slane %v938_v24, 1  ;;  %v234_v46 = vld [vmem:[%s1047_s1] sm:$0xf]  ;;  %v396_v62 = vperm.slane %v933_v23, 3  ;;  %s202_s7 = scalar_lea.vmem %s1049_s3, %s918_s17 }
   0xe   : > { %v208_v0 = vld [vmem:[%s198_s20] sm:$0xff]  ;;  %v397_v63 = vperm.slane %v938_v24, 3  ;;  %s206_s10 = scalar_lea.vmem %s1050_s4, %s918_s17 }
   0xf   : > { %214 = vst [vmem:[#allocation1] ss:$2 sm:$0xff] %v208_v0  ;;  %vm225_vm0 = vcmp.lt.s32.totalorder %v928_v22, 17  ;;  %vm336_vm1 = vcmp.lt.s32.totalorder %v928_v22, 15  ;;  %vm244_vm3 = vcmp.lt.s32.totalorder %v928_v22, 16  ;;  %vm393_vm5 = vcmp.lt.s32.totalorder %v928_v22, 1 }
  0x10   : > { %vm496_vm6 = vcmp.lt.s32.totalorder %v928_v22, 127  ;;  %vm553_vm7 = vcmp.lt.s32.totalorder %v928_v22, 113  ;;  %vm610_vm8 = vcmp.lt.s32.totalorder %v928_v22, 112  ;;  %vm667_vm9 = vcmp.lt.s32.totalorder %v928_v22, 111 }
  0x16   : > { %v215_v1 = vld.sshfl [vmem:[#allocation1] sm:$0xff pattern:$0x75316420]  ;;  %v216_v2 = vld.sshfl [vmem:[#allocation1 + $0x8] sm:$0xff pattern:$0x75316420] }
  0x17   : > { %219 = vrot.lane.b32.xlu1 %v215_v1, %s877_s21  ;;  %235 = vst [vmem:[#allocation1] ss:$2 sm:$0xff] %v208_v0 }
  0x1e   : > { %v236_v3 = vld.sshfl [vmem:[#allocation1] sm:$0xff pattern:$0x75316420]  ;;  %v237_v4 = vld.sshfl [vmem:[#allocation1 + $0x8] sm:$0xff pattern:$0x75316420] }
  0x1f   : > { %240 = vrot.lane.b32.xlu0 %v236_v3, %s878_s22  ;;  %221 = vrot.lane.b32.xlu1 %v216_v2, %s877_s21  ;;  %327 = vst [vmem:[#allocation1] ss:$2 sm:$0xff] %v208_v0 }
  0x26   : > { %v328_v5 = vld.sshfl [vmem:[#allocation1] sm:$0xff pattern:$0x75316420]  ;;  %v329_v6 = vld.sshfl [vmem:[#allocation1 + $0x8] sm:$0xff pattern:$0x75316420] }
  0x27   : > { %242 = vrot.lane.b32.xlu0 %v237_v4, %s878_s22  ;;  %332 = vrot.lane.b32.xlu2 %v328_v5, %s879_s23  ;;  %384 = vst [vmem:[#allocation1] ss:$2 sm:$0xff] %v208_v0 }
  0x2e   : > { %v386_v7 = vld.sshfl [vmem:[#allocation1 + $0x8] sm:$0xff pattern:$0x75316420]  ;;  %v385_v8 = vld.sshfl [vmem:[#allocation1] sm:$0xff pattern:$0x75316420] }
  0x2f   : > { %391 = vrot.lane.b32.xlu1 %v386_v7, %s880_s24  ;;  %389 = vrot.lane.b32.xlu0 %v385_v8, %s880_s24  ;;  %441 = vst [vmem:[#allocation1] ss:$2 sm:$0xff] %v208_v0 }
  0x30   : > { %334 = vrot.lane.b32.xlu2 %v329_v6, %s879_s23 }
  0x36   : > { %v924_v9 = vld.sshfl [vmem:[#allocation1] sm:$0xff pattern:$0x75316420]  ;;  %v926_v10 = vld.sshfl [vmem:[#allocation1 + $0x8] sm:$0xff pattern:$0x75316420] }
  0x37   : > { %487 = vst [vmem:[#allocation1] ss:$2 sm:$0xff] %v208_v0  ;;  %v446_v56 = vpack.c.bf16 %v924_v9, %v924_v9  ;;  %v447_v57 = vpack.c.bf16 %v926_v10, %v926_v10 }
  0x39   : > { %v454_v3 = vsel %vm259_vm2, %v446_v56, 0  ;;  %v457_v4 = vsel %vm259_vm2, %v447_v57, 0  ;;  %v842_v57 = vld [vmem:[%s1047_s1 + $0x1c] sm:$0xf] }
  0x3e   : > { %v489_v11 = vld.sshfl [vmem:[#allocation1 + $0x8] sm:$0xff pattern:$0x75316420]  ;;  %v488_v12 = vld.sshfl [vmem:[#allocation1] sm:$0xff pattern:$0x75316420] }
  0x3f   : > { %494 = vrot.lane.b32.xlu0 %v489_v11, %s881_s25  ;;  %544 = vst [vmem:[#allocation1] ss:$2 sm:$0xff] %v208_v0  ;;  %492 = vrot.lane.b32.xlu2 %v488_v12, %s881_s25 }
  0x46   : > { %v545_v13 = vld.sshfl [vmem:[#allocation1] sm:$0xff pattern:$0x75316420]  ;;  %v546_v14 = vld.sshfl [vmem:[#allocation1 + $0x8] sm:$0xff pattern:$0x75316420] }
  0x47   : > { %549 = vrot.lane.b32.xlu1 %v545_v13, %s882_s26  ;;  %601 = vst [vmem:[#allocation1] ss:$2 sm:$0xff] %v208_v0  ;;  %551 = vrot.lane.b32.xlu2 %v546_v14, %s882_s26  ;;  %v830_v13 = vld [vmem:[%s1047_s1 + $0xc] sm:$0xf]  ;;  %v499_v14 = vperm.slane %v933_v23, 5 }
  0x4e   : > { %v603_v15 = vld.sshfl [vmem:[#allocation1 + $0x8] sm:$0xff pattern:$0x75316420]  ;;  %v602_v16 = vld.sshfl [vmem:[#allocation1] sm:$0xff pattern:$0x75316420] }
  0x4f   : > { %608 = vrot.lane.b32.xlu1 %v603_v15, %s883_s27  ;;  %606 = vrot.lane.b32.xlu0 %v602_v16, %s883_s27  ;;  %658 = vst [vmem:[#allocation1] ss:$2 sm:$0xff] %v208_v0  ;;  %v822_v0 = vld [vmem:[%s1047_s1 + $0x4] sm:$0xf]  ;;  %v500_v15 = vperm.slane %v938_v24, 5 }
  0x56   : > { %v660_v17 = vld.sshfl [vmem:[#allocation1 + $0x8] sm:$0xff pattern:$0x75316420]  ;;  %v659_v18 = vld.sshfl [vmem:[#allocation1] sm:$0xff pattern:$0x75316420] }
  0x57   : > { %665 = vrot.lane.b32.xlu0 %v660_v17, %s884_s28  ;;  %663 = vrot.lane.b32.xlu2 %v659_v18, %s884_s28  ;;  %v827_v17 = vld [vmem:[%s1047_s1 + $0x8] sm:$0xf] }
  0x81   : > { %v333_v19 = vpop.permute.xlu2 %332 }
  0x89   : > { %v220_v21 = vpop.permute.xlu1 %219 }
  0x8a   : > { %v335_v27 = vpop.permute.xlu2 %334 }
  0x8b   : > { %v337_v34 = vsel %vm336_vm1, %v333_v19, %v335_v27  ;;  %v338_v35 = vsel %vm336_vm1, %v335_v27, %v333_v19 }
  0x8c   : > { %v341_v40 = vmul.f32 %v339_v32, %v338_v35  ;;  %v342_v41 = vmul.f32 %v340_v33, %v337_v34  ;;  %v557_v32 = vperm.slane %v938_v24, 6  ;;  %v836_v33 = vld [vmem:[%s1047_s1 + $0x14] sm:$0xf] }
  0x8e   : > { %v343_v50 = vpack.c.bf16 %v341_v40, %v341_v40  ;;  %v344_v51 = vpack.c.bf16 %v342_v41, %v342_v41 }
  0x90   : > { %v351_v58 = vsel %vm259_vm2, %v343_v50, 0  ;;  %v354_v59 = vsel %vm259_vm2, %v344_v51, 0 }
  0x91   : > { %v241_v28 = vpop.permute.xlu0 %240  ;;  %v222_v29 = vpop.permute.xlu1 %221 }
  0x92   : > { %v226_v30 = vsel %vm225_vm0, %v220_v21, %v222_v29  ;;  %v227_v31 = vsel %vm225_vm0, %v222_v29, %v220_v21 }
  0x93   : > { %v230_v36 = vmul.f32 %v228_v25, %v227_v31  ;;  %v231_v37 = vmul.f32 %v229_v26, %v226_v30  ;;  %v556_v31 = vperm.slane %v933_v23, 6 }
  0x95   : > { %v232_v38 = vpack.c.bf16 %v230_v36, %v230_v36  ;;  %v233_v39 = vpack.c.bf16 %v231_v37, %v231_v37 }
  0x97   : > { %v296_v42 = vsel %vm259_vm2, %v232_v38, 0  ;;  %v299_v43 = vsel %vm259_vm2, %v233_v39, 0 }
  0x98   : > { %308 = vmatpush.bf16.msra.mxu2 %v296_v42  ;;  %321 = vmatpush.bf16.msra.mxu3 %v299_v43  ;;  %v613_v43 = vperm.slane %v933_v23, 7 }
  0x99   : > { %v243_v47 = vpop.permute.xlu0 %242  ;;  %v493_v16 = vpop.permute.xlu2 %492 }
  0x9a   : > { %v245_v48 = vsel %vm244_vm3, %v241_v28, %v243_v47  ;;  %v246_v49 = vsel %vm244_vm3, %v243_v47, %v241_v28 }
  0x9b   : > { %825 = vmatmul.msk.bf16.vlgmr.msra.gmra.mxu2 %vm255_vm4, %v234_v46  ;;  %826 = vmatmul.msk.bf16.vlgmr.msra.gmra.mxu3 %vm255_vm4, %v234_v46  ;;  %v249_v52 = vmul.f32 %v247_v44, %v246_v49  ;;  %v250_v53 = vmul.f32 %v248_v45, %v245_v48  ;;  %v614_v44 = vperm.slane %v938_v24, 7  ;;  %v833_v45 = vld [vmem:[%s1047_s1 + $0x10] sm:$0xf] }
  0x9d   : > { %v251_v54 = vpack.c.bf16 %v249_v52, %v249_v52  ;;  %v252_v55 = vpack.c.bf16 %v250_v53, %v250_v53 }
  0x9f   : > { %v261_v60 = vsel %vm259_vm2, %v251_v54, 0  ;;  %v264_v61 = vsel %vm259_vm2, %v252_v55, 0  ;;  %v867_v54 = vld [vmem:[%s1048_s2 + $0x10] ss:$0 sm:$0xff]  ;;  %v868_v55 = vld [vmem:[%s1048_s2 + $0x18] ss:$0 sm:$0xff] }
  0xa0   : > { %273 = vmatpush.bf16.msra.mxu0 %v261_v60  ;;  %286 = vmatpush.bf16.msra.mxu1 %v264_v61 }
  0xa1   : > { %v392_v1 = vpop.permute.xlu1 %391  ;;  %v390_v2 = vpop.permute.xlu0 %389 }
  0xa2   : > { %v394_v5 = vsel %vm393_vm5, %v390_v2, %v392_v1  ;;  %v395_v6 = vsel %vm393_vm5, %v392_v1, %v390_v2  ;;  %v552_v30 = vpop.permute.xlu2 %551  ;;  %v839_v2 = vld [vmem:[%s1047_s1 + $0x18] sm:$0xf] }
  0xa3   : > { %823 = vmatmul.msk.bf16.vlgmr.msra.gmra.mxu0 %vm255_vm4, %v822_v0  ;;  %824 = vmatmul.msk.bf16.vlgmr.msra.gmra.mxu1 %vm255_vm4, %v822_v0  ;;  %v398_v7 = vmul.f32 %v396_v62, %v395_v6  ;;  %v399_v8 = vmul.f32 %v397_v63, %v394_v5 }
  0xa4   : > { %363 = vmatpush.bf16.msrb.mxu0 %v351_v58  ;;  %376 = vmatpush.bf16.msrb.mxu1 %v354_v59 }
  0xa5   : > { %v400_v9 = vpack.c.bf16 %v398_v7, %v398_v7  ;;  %v401_v10 = vpack.c.bf16 %v399_v8, %v399_v8 }
  0xa7   : > { %v408_v11 = vsel %vm259_vm2, %v400_v9, 0  ;;  %v411_v12 = vsel %vm259_vm2, %v401_v10, 0 }
  0xa8   : > { %466 = vmatpush.bf16.msra.mxu0 %v454_v3  ;;  %479 = vmatpush.bf16.msra.mxu1 %v457_v4  ;;  %v845_v3 = vld [vmem:[%s1047_s1 + $0x20] sm:$0xf] }
  0xa9   : > { %420 = vmatpush.bf16.msrb.mxu2 %v408_v11  ;;  %433 = vmatpush.bf16.msrb.mxu3 %v411_v12 }
  0xac   : > { %831 = vmatmul.msk.bf16.vlgmr.msrb.gmra.mxu2 %vm255_vm4, %v830_v13  ;;  %832 = vmatmul.msk.bf16.vlgmr.msrb.gmra.mxu3 %vm255_vm4, %v830_v13 }
  0xb1   : > { %v495_v18 = vpop.permute.xlu0 %494  ;;  %v664_v56 = vpop.permute.xlu2 %663 }
  0xb2   : > { %v497_v19 = vsel %vm496_vm6, %v493_v16, %v495_v18  ;;  %v498_v20 = vsel %vm496_vm6, %v495_v18, %v493_v16 }
  0xb3   : > { %828 = vmatmul.msk.bf16.vlgmr.msrb.gmra.mxu0 %vm255_vm4, %v827_v17  ;;  %829 = vmatmul.msk.bf16.vlgmr.msrb.gmra.mxu1 %vm255_vm4, %v827_v17  ;;  %v501_v21 = vmul.f32 %v499_v14, %v497_v19  ;;  %v502_v25 = vmul.f32 %v500_v15, %v498_v20 }
  0xb5   : > { %v503_v26 = vpack.c.bf16 %v501_v21, %v501_v21  ;;  %v504_v27 = vpack.c.bf16 %v502_v25, %v502_v25 }
  0xb7   : > { %v511_v28 = vsel %vm259_vm2, %v503_v26, 0  ;;  %v514_v29 = vsel %vm259_vm2, %v504_v27, 0 }
  0xb8   : > { %523 = vmatpush.bf16.msra.mxu2 %v511_v28  ;;  %536 = vmatpush.bf16.msra.mxu3 %v514_v29 }
  0xb9   : > { %v550_v34 = vpop.permute.xlu1 %549 }
  0xba   : > { %v554_v35 = vsel %vm553_vm7, %v550_v34, %v552_v30  ;;  %v555_v36 = vsel %vm553_vm7, %v552_v30, %v550_v34 }
  0xbb   : > { %v558_v37 = vmul.f32 %v556_v31, %v554_v35  ;;  %v559_v38 = vmul.f32 %v557_v32, %v555_v36 }
  0xbc   : > { %837 = vmatmul.msk.bf16.vlgmr.msra.gmra.mxu2 %vm255_vm4, %v836_v33  ;;  %838 = vmatmul.msk.bf16.vlgmr.msra.gmra.mxu3 %vm255_vm4, %v836_v33 }
  0xbd   : > { %v560_v39 = vpack.c.bf16 %v558_v37, %v558_v37  ;;  %v561_v40 = vpack.c.bf16 %v559_v38, %v559_v38 }
  0xbf   : > { %v568_v41 = vsel %vm259_vm2, %v560_v39, 0  ;;  %v571_v42 = vsel %vm259_vm2, %v561_v40, 0 }
  0xc0   : > { %580 = vmatpush.bf16.msrb.mxu0 %v568_v41  ;;  %593 = vmatpush.bf16.msrb.mxu1 %v571_v42 }
  0xc1   : > { %v609_v46 = vpop.permute.xlu1 %608  ;;  %v607_v47 = vpop.permute.xlu0 %606 }
  0xc2   : > { %v611_v48 = vsel %vm610_vm8, %v607_v47, %v609_v46  ;;  %v612_v49 = vsel %vm610_vm8, %v609_v46, %v607_v47 }
  0xc3   : > { %834 = vmatmul.msk.bf16.vlgmr.msra.gmra.mxu0 %vm255_vm4, %v833_v45  ;;  %835 = vmatmul.msk.bf16.vlgmr.msra.gmra.mxu1 %vm255_vm4, %v833_v45  ;;  %v615_v50 = vmul.f32 %v613_v43, %v611_v48  ;;  %v616_v51 = vmul.f32 %v614_v44, %v612_v49 }
  0xc5   : > { %v617_v52 = vpack.c.bf16 %v615_v50, %v615_v50  ;;  %v618_v23 = vpack.c.bf16 %v616_v51, %v616_v51 }
  0xc7   : > { %v625_v24 = vsel %vm259_vm2, %v617_v52, 0  ;;  %v628_v53 = vsel %vm259_vm2, %v618_v23, 0 }
  0xc8   : > { %637 = vmatpush.bf16.msrb.mxu2 %v625_v24  ;;  %650 = vmatpush.bf16.msrb.mxu3 %v628_v53 }
  0xc9   : > { %v666_v22 = vpop.permute.xlu0 %665 }
  0xca   : > { %v668_v58 = vsel %vm667_vm9, %v664_v56, %v666_v22  ;;  %v669_v59 = vsel %vm667_vm9, %v666_v22, %v664_v56 }
  0xcb   : > { %v672_v60 = vmul.f32 %v867_v54, %v668_v58  ;;  %v673_v61 = vmul.f32 %v868_v55, %v669_v59 }
  0xcc   : > { %843 = vmatmul.msk.bf16.vlgmr.msrb.gmra.mxu2 %vm255_vm4, %v842_v57  ;;  %844 = vmatmul.msk.bf16.vlgmr.msrb.gmra.mxu3 %vm255_vm4, %v842_v57 }
  0xcd   : > { %v674_v62 = vpack.c.bf16 %v672_v60, %v672_v60  ;;  %v675_v63 = vpack.c.bf16 %v673_v61, %v673_v61 }
  0xcf   : > { %v682_v0 = vsel %vm259_vm2, %v674_v62, 0  ;;  %v685_v1 = vsel %vm259_vm2, %v675_v63, 0 }
  0xd0   : > { %694 = vmatpush.bf16.msra.mxu0 %v682_v0  ;;  %707 = vmatpush.bf16.msra.mxu1 %v685_v1 }
  0xd3   : > { %840 = vmatmul.msk.bf16.vlgmr.msrb.gmra.mxu0 %vm255_vm4, %v839_v2  ;;  %841 = vmatmul.msk.bf16.vlgmr.msrb.gmra.mxu1 %vm255_vm4, %v839_v2 }
  0xe3   : > { %846 = vmatmul.msk.bf16.vlgmr.msra.gmra.mxu0 %vm255_vm4, %v845_v3  ;;  %847 = vmatmul.msk.bf16.vlgmr.msra.gmra.mxu1 %vm255_vm4, %v845_v3 }
 0x11e   : > { %v310_v4 = vpop.f32.mrf.mxu2  ;;  %v323_v5 = vpop.f32.mrf.mxu3 }
 0x120   : > { %v275_v6 = vpop.f32.mrf.mxu0  ;;  %v288_v7 = vpop.f32.mrf.mxu1 }
 0x121   : > { %v311_v31 = vadd.f32 %v310_v4, %v275_v6  ;;  %v324_v32 = vadd.f32 %v323_v5, %v288_v7 }
 0x126   : > { %v312_v8 = vpop.f32.mrf.mxu2  ;;  %v325_v9 = vpop.f32.mrf.mxu3 }
 0x128   : > { %v277_v10 = vpop.f32.mrf.mxu0  ;;  %v290_v11 = vpop.f32.mrf.mxu1 }
 0x12f   : > { %v422_v12 = vpop.f32.mrf.mxu2  ;;  %v435_v13 = vpop.f32.mrf.mxu3 }
 0x130   : > { %v365_v14 = vpop.f32.mrf.mxu0  ;;  %v378_v15 = vpop.f32.mrf.mxu1 }
 0x131   : > { %v382_v35 = vadd.f32 %v365_v14, %v311_v31  ;;  %v383_v36 = vadd.f32 %v378_v15, %v324_v32 }
 0x133   : > { %v439_v39 = vadd.f32 %v422_v12, %v382_v35  ;;  %v440_v40 = vadd.f32 %v435_v13, %v383_v36 }
 0x137   : > { %v424_v16 = vpop.f32.mrf.mxu2  ;;  %v437_v17 = vpop.f32.mrf.mxu3 }
 0x138   : > { %v367_v18 = vpop.f32.mrf.mxu0  ;;  %v380_v19 = vpop.f32.mrf.mxu1 }
 0x13f   : > { %v525_v20 = vpop.f32.mrf.mxu2  ;;  %v538_v21 = vpop.f32.mrf.mxu3 }
 0x140   : > { %v468_v25 = vpop.f32.mrf.mxu0  ;;  %v481_v26 = vpop.f32.mrf.mxu1 }
 0x141   : > { %v485_v41 = vadd.f32 %v468_v25, %v439_v39  ;;  %v486_v42 = vadd.f32 %v481_v26, %v440_v40 }
 0x143   : > { %v542_v47 = vadd.f32 %v525_v20, %v485_v41  ;;  %v543_v48 = vadd.f32 %v538_v21, %v486_v42 }
 0x147   : > { %v527_v27 = vpop.f32.mrf.mxu2  ;;  %v540_v28 = vpop.f32.mrf.mxu3 }
 0x148   : > { %v470_v29 = vpop.f32.mrf.mxu0  ;;  %v483_v30 = vpop.f32.mrf.mxu1 }
 0x14f   : > { %v639_v33 = vpop.f32.mrf.mxu2  ;;  %v652_v34 = vpop.f32.mrf.mxu3 }
 0x150   : > { %v582_v37 = vpop.f32.mrf.mxu0  ;;  %v595_v38 = vpop.f32.mrf.mxu1 }
 0x151   : > { %v599_v49 = vadd.f32 %v582_v37, %v542_v47  ;;  %v600_v50 = vadd.f32 %v595_v38, %v543_v48 }
 0x153   : > { %v656_v51 = vadd.f32 %v639_v33, %v599_v49  ;;  %v657_v52 = vadd.f32 %v652_v34, %v600_v50 }
 0x157   : > { %v641_v43 = vpop.f32.mrf.mxu2  ;;  %v654_v44 = vpop.f32.mrf.mxu3 }
 0x158   : > { %v584_v45 = vpop.f32.mrf.mxu0  ;;  %v597_v46 = vpop.f32.mrf.mxu1 }
 0x160   : > { %v696_v23 = vpop.f32.mrf.mxu0  ;;  %v709_v24 = vpop.f32.mrf.mxu1 }
 0x161   : > { %v713_v53 = vadd.f32 %v696_v23, %v656_v51  ;;  %v714_v54 = vadd.f32 %v709_v24, %v657_v52 }
 0x163   : > { %v715_v55 = vadd.f32 %v714_v54, %v713_v53 }
 0x165   : > { %716 = vadd.xlane.f32.xlu1 %v715_v55 }
 0x168   : > { %v698_v56 = vpop.f32.mrf.mxu0  ;;  %v711_v57 = vpop.f32.mrf.mxu1 }
 0x1d8   : > { %v717_v22 = vpop.xlane.xlu1 %716 }
 0x1d9   : > { %v718_v58 = vmul.f32 0.00390625, %v717_v22  ;;  %722 = vst.msk [vmem:[%s202_s7] sm:$0xff] %vm721_vm10, %v717_v22 }
 0x1db   : > { %v719_v59 = vsub.f32 %v713_v53, %v718_v58  ;;  %v720_v60 = vsub.f32 %v714_v54, %v718_v58 }
 0x1dd   : > { %v723_v61 = vmul.f32 %v719_v59, %v719_v59  ;;  %v724_v62 = vmul.f32 %v720_v60, %v720_v60 }
 0x1df   : > { %v725_v63 = vadd.f32 %v724_v62, %v723_v61 }
 0x1e1   : > { %726 = vadd.xlane.f32.xlu2 %v725_v63 }
 0x254   : > { %v727_v0 = vpop.xlane.xlu2 %726 }
 0x255   : > { %728 = vst.msk [vmem:[%s206_s10] sm:$0xff] %vm721_vm10, %v727_v0 }
 0x256 PF: > { %s15_s15 = sadd.s32 1, %s875_s15  }
 0x257   : > { %p12_p4 = scmp.ge.s32.totalorder %s15_s15, 4  }
 0x259   :  { %14 = sbr.rel (!%p12_p4) target bundleno = 1 (0x1), region = 82 }

// kernel: cblr_forward.3
= control target key start
LH: loop header
LB: loop body
LE: loop exit
PB: predicated region body
PF: predicated region fallthrough
CT: control target
= control target key end

     0   :  { %s920_s18 = smov 0   ;;  %s1058_s0 = inlined_call_operand.vmem [shape: f32[2,4,256], index: 0, kind: input, shape index: {}]   ;;  %s1059_s1 = inlined_call_operand.vmem [shape: bf16[9,8,4], index: 1, kind: input, shape index: {}]   ;;  %s1060_s2 = inlined_call_operand.vmem [shape: f32[9,256], index: 2, kind: input, shape index: {}]   ;;  %s1061_s3 = inlined_call_operand.vmem [shape: f32[8,1], index: 3, kind: input, shape index: {}]   ;;  %s1062_s4 = inlined_call_operand.vmem [shape: f32[8,1], index: 4, kind: input, shape index: {}]   ;;  %s1063_s5 = inlined_call_operand.vmem [shape: f32[2,8,256], index: 5, kind: output, shape index: {}]  }
   0x1 LB: > { %s812_s19 = sadd.s32 4294967295, %s879_s18   ;;  %p816_p0 = scmp.ge.s32.totalorder %s879_s18, 1  ;;  %s879_s18 = sphi %s920_s18, %s15_s18  }
   0x2   : > { %p187_p1 = scmp.lt.s32.totalorder %s879_s18, 3 }
   0x4   : > { %p188_p2 = pnand %p816_p0, %p187_p1 }
   0x5   : > { %p215_p3 = scmp.lt.s32.totalorder (!%p188_p2), %s812_s19, 1  ;;  %s881_s24 = smov (!%p188_p2), 17  }
   0x6   : > { %191 = sbr.rel (%p188_p2) target bundleno = 364 (0x16c), region = 40  ;;  %s882_s25 = smov (!%p188_p2), 16  }
   0x7   : > { %s883_s26 = smov (!%p188_p2), 15   ;;  %s884_s27 = smov (!%p188_p2), 1  }
   0x8   : > { %s885_s28 = smov (!%p188_p2), 127   ;;  %s886_s29 = smov (!%p188_p2), 113  }
   0x9   : > { %s887_s30 = smov (!%p188_p2), 112   ;;  %s888_s6 = smov (!%p188_p2), 111  }
   0xb   : > { %s1065_s19 = smov (!%p215_p3, %s812_s19), 1  ;;  %v241_v20 = vlaneseq  ;;  %v943_v23 = vld [vmem:[%s1060_s2] sm:$0xff]  ;;  %v948_v24 = vld [vmem:[%s1060_s2 + $0x8] sm:$0xff]  ;;  %vm277_vm2 = vcmask 1041408   ;;  %vm273_vm4 = vcmask 31744  }
   0xc   : > { %s849_s20 = sshll.u32 %s1065_s19, 3  ;;  %v246_v25 = vperm.slane %v943_v23, 0  ;;  %v247_v26 = vperm.slane %v948_v24, 0  ;;  %v357_v32 = vperm.slane %v943_v23, 2  ;;  %v358_v33 = vperm.slane %v948_v24, 2  ;;  %s850_s14 = sshll.u32 %s1065_s19, 4 }
   0xd   : > { %s219_s23 = scalar_lea.vmem %s1058_s0, %s849_s20  ;;  %v938_v22 = vand.u32 127, %v241_v20  ;;  %v265_v44 = vperm.slane %v943_v23, 1  ;;  %v266_v45 = vperm.slane %v948_v24, 1  ;;  %v252_v46 = vld [vmem:[%s1059_s1] sm:$0xf]  ;;  %v414_v62 = vperm.slane %v943_v23, 3  ;;  %s224_s17 = scalar_lea.vmem %s1063_s5, %s850_s14 }
   0xe   : > { %v226_v0 = vld [vmem:[%s219_s23] sm:$0xff]  ;;  %v415_v63 = vperm.slane %v948_v24, 3 }
   0xf   : > { %232 = vst [vmem:[#allocation1] ss:$2 sm:$0xff] %v226_v0  ;;  %vm243_vm0 = vcmp.lt.s32.totalorder %v938_v22, 17  ;;  %vm354_vm1 = vcmp.lt.s32.totalorder %v938_v22, 15  ;;  %vm262_vm3 = vcmp.lt.s32.totalorder %v938_v22, 16  ;;  %vm411_vm5 = vcmp.lt.s32.totalorder %v938_v22, 1 }
  0x10   : > { %vm514_vm6 = vcmp.lt.s32.totalorder %v938_v22, 127  ;;  %vm571_vm7 = vcmp.lt.s32.totalorder %v938_v22, 113  ;;  %vm628_vm8 = vcmp.lt.s32.totalorder %v938_v22, 112  ;;  %vm685_vm9 = vcmp.lt.s32.totalorder %v938_v22, 111  ;;  %v841_v22 = vld [vmem:[%s1059_s1 + $0x1c] sm:$0xf] }
  0x16   : > { %v233_v1 = vld.sshfl [vmem:[#allocation1] sm:$0xff pattern:$0x75316420]  ;;  %v234_v2 = vld.sshfl [vmem:[#allocation1 + $0x8] sm:$0xff pattern:$0x75316420] }
  0x17   : > { %237 = vrot.lane.b32.xlu1 %v233_v1, %s881_s24  ;;  %253 = vst [vmem:[#allocation1] ss:$2 sm:$0xff] %v226_v0 }
  0x1e   : > { %v254_v3 = vld.sshfl [vmem:[#allocation1] sm:$0xff pattern:$0x75316420]  ;;  %v255_v4 = vld.sshfl [vmem:[#allocation1 + $0x8] sm:$0xff pattern:$0x75316420] }
  0x1f   : > { %258 = vrot.lane.b32.xlu0 %v254_v3, %s882_s25  ;;  %239 = vrot.lane.b32.xlu1 %v234_v2, %s881_s24  ;;  %345 = vst [vmem:[#allocation1] ss:$2 sm:$0xff] %v226_v0 }
  0x26   : > { %v346_v5 = vld.sshfl [vmem:[#allocation1] sm:$0xff pattern:$0x75316420]  ;;  %v347_v6 = vld.sshfl [vmem:[#allocation1 + $0x8] sm:$0xff pattern:$0x75316420] }
  0x27   : > { %260 = vrot.lane.b32.xlu0 %v255_v4, %s882_s25  ;;  %350 = vrot.lane.b32.xlu2 %v346_v5, %s883_s26  ;;  %402 = vst [vmem:[#allocation1] ss:$2 sm:$0xff] %v226_v0 }
  0x2e   : > { %v404_v7 = vld.sshfl [vmem:[#allocation1 + $0x8] sm:$0xff pattern:$0x75316420]  ;;  %v403_v8 = vld.sshfl [vmem:[#allocation1] sm:$0xff pattern:$0x75316420] }
  0x2f   : > { %409 = vrot.lane.b32.xlu1 %v404_v7, %s884_s27  ;;  %407 = vrot.lane.b32.xlu0 %v403_v8, %s884_s27  ;;  %459 = vst [vmem:[#allocation1] ss:$2 sm:$0xff] %v226_v0 }
  0x30   : > { %352 = vrot.lane.b32.xlu2 %v347_v6, %s883_s26 }
  0x36   : > { %v934_v9 = vld.sshfl [vmem:[#allocation1] sm:$0xff pattern:$0x75316420]  ;;  %v936_v10 = vld.sshfl [vmem:[#allocation1 + $0x8] sm:$0xff pattern:$0x75316420] }
  0x37   : > { %505 = vst [vmem:[#allocation1] ss:$2 sm:$0xff] %v226_v0  ;;  %v464_v56 = vpack.c.bf16 %v934_v9, %v934_v9  ;;  %v465_v57 = vpack.c.bf16 %v936_v10, %v936_v10 }
  0x39   : > { %v472_v3 = vsel %vm277_vm2, %v464_v56, 0  ;;  %v475_v4 = vsel %vm277_vm2, %v465_v57, 0  ;;  %v871_v57 = vld [vmem:[%s1060_s2 + $0x10] ss:$0 sm:$0xff] }
  0x3e   : > { %v507_v11 = vld.sshfl [vmem:[#allocation1 + $0x8] sm:$0xff pattern:$0x75316420]  ;;  %v506_v12 = vld.sshfl [vmem:[#allocation1] sm:$0xff pattern:$0x75316420] }
  0x3f   : > { %512 = vrot.lane.b32.xlu0 %v507_v11, %s885_s28  ;;  %562 = vst [vmem:[#allocation1] ss:$2 sm:$0xff] %v226_v0  ;;  %510 = vrot.lane.b32.xlu2 %v506_v12, %s885_s28 }
  0x46   : > { %v563_v13 = vld.sshfl [vmem:[#allocation1] sm:$0xff pattern:$0x75316420]  ;;  %v564_v14 = vld.sshfl [vmem:[#allocation1 + $0x8] sm:$0xff pattern:$0x75316420] }
  0x47   : > { %567 = vrot.lane.b32.xlu1 %v563_v13, %s886_s29  ;;  %619 = vst [vmem:[#allocation1] ss:$2 sm:$0xff] %v226_v0  ;;  %569 = vrot.lane.b32.xlu2 %v564_v14, %s886_s29  ;;  %v829_v13 = vld [vmem:[%s1059_s1 + $0xc] sm:$0xf]  ;;  %v517_v14 = vperm.slane %v943_v23, 5 }
  0x4e   : > { %v621_v15 = vld.sshfl [vmem:[#allocation1 + $0x8] sm:$0xff pattern:$0x75316420]  ;;  %v620_v16 = vld.sshfl [vmem:[#allocation1] sm:$0xff pattern:$0x75316420] }
  0x4f   : > { %626 = vrot.lane.b32.xlu1 %v621_v15, %s887_s30  ;;  %624 = vrot.lane.b32.xlu0 %v620_v16, %s887_s30  ;;  %676 = vst [vmem:[#allocation1] ss:$2 sm:$0xff] %v226_v0  ;;  %v821_v0 = vld [vmem:[%s1059_s1 + $0x4] sm:$0xf]  ;;  %v518_v15 = vperm.slane %v948_v24, 5 }
  0x56   : > { %v678_v17 = vld.sshfl [vmem:[#allocation1 + $0x8] sm:$0xff pattern:$0x75316420]  ;;  %v677_v18 = vld.sshfl [vmem:[#allocation1] sm:$0xff pattern:$0x75316420] }
  0x57   : > { %683 = vrot.lane.b32.xlu0 %v678_v17, %s888_s6  ;;  %681 = vrot.lane.b32.xlu2 %v677_v18, %s888_s6  ;;  %v826_v17 = vld [vmem:[%s1059_s1 + $0x8] sm:$0xf] }
  0x81   : > { %v351_v19 = vpop.permute.xlu2 %350 }
  0x89   : > { %v238_v21 = vpop.permute.xlu1 %237 }
  0x8a   : > { %v353_v27 = vpop.permute.xlu2 %352 }
  0x8b   : > { %v355_v34 = vsel %vm354_vm1, %v351_v19, %v353_v27  ;;  %v356_v35 = vsel %vm354_vm1, %v353_v27, %v351_v19 }
  0x8c   : > { %v359_v40 = vmul.f32 %v357_v32, %v356_v35  ;;  %v360_v41 = vmul.f32 %v358_v33, %v355_v34  ;;  %v575_v32 = vperm.slane %v948_v24, 6  ;;  %v835_v33 = vld [vmem:[%s1059_s1 + $0x14] sm:$0xf] }
  0x8e   : > { %v361_v50 = vpack.c.bf16 %v359_v40, %v359_v40  ;;  %v362_v51 = vpack.c.bf16 %v360_v41, %v360_v41 }
  0x90   : > { %v369_v58 = vsel %vm277_vm2, %v361_v50, 0  ;;  %v372_v59 = vsel %vm277_vm2, %v362_v51, 0 }
  0x91   : > { %v259_v28 = vpop.permute.xlu0 %258  ;;  %v240_v29 = vpop.permute.xlu1 %239 }
  0x92   : > { %v244_v30 = vsel %vm243_vm0, %v238_v21, %v240_v29  ;;  %v245_v31 = vsel %vm243_vm0, %v240_v29, %v238_v21 }
  0x93   : > { %v248_v36 = vmul.f32 %v246_v25, %v245_v31  ;;  %v249_v37 = vmul.f32 %v247_v26, %v244_v30  ;;  %v574_v31 = vperm.slane %v943_v23, 6 }
  0x95   : > { %v250_v38 = vpack.c.bf16 %v248_v36, %v248_v36  ;;  %v251_v39 = vpack.c.bf16 %v249_v37, %v249_v37 }
  0x97   : > { %v314_v42 = vsel %vm277_vm2, %v250_v38, 0  ;;  %v317_v43 = vsel %vm277_vm2, %v251_v39, 0 }
  0x98   : > { %326 = vmatpush.bf16.msra.mxu2 %v314_v42  ;;  %339 = vmatpush.bf16.msra.mxu3 %v317_v43  ;;  %v631_v43 = vperm.slane %v943_v23, 7  ;;  %v733_v23 = vld [vmem:[%s1061_s3] sm:$0xff] }
  0x99   : > { %v261_v47 = vpop.permute.xlu0 %260  ;;  %v511_v16 = vpop.permute.xlu2 %510 }
  0x9a   : > { %v263_v48 = vsel %vm262_vm3, %v259_v28, %v261_v47  ;;  %v264_v49 = vsel %vm262_vm3, %v261_v47, %v259_v28 }
  0x9b   : > { %824 = vmatmul.msk.bf16.vlgmr.msra.gmra.mxu2 %vm273_vm4, %v252_v46  ;;  %825 = vmatmul.msk.bf16.vlgmr.msra.gmra.mxu3 %vm273_vm4, %v252_v46  ;;  %v267_v52 = vmul.f32 %v265_v44, %v264_v49  ;;  %v268_v53 = vmul.f32 %v266_v45, %v263_v48  ;;  %v632_v44 = vperm.slane %v948_v24, 7  ;;  %v832_v45 = vld [vmem:[%s1059_s1 + $0x10] sm:$0xf]  ;;  %v741_v24 = vld [vmem:[%s1062_s4] sm:$0xff] }
  0x9d   : > { %v269_v54 = vpack.c.bf16 %v267_v52, %v267_v52  ;;  %v270_v55 = vpack.c.bf16 %v268_v53, %v268_v53  ;;  %v889_v52 = vmov 0  }
  0x9e   : > { %868 = vset.pattern.permute.xlu1 %v889_v52  ;;  %869 = vset.pattern.permute.xlu2 %v889_v52 }
  0x9f   : > { %v279_v60 = vsel %vm277_vm2, %v269_v54, 0  ;;  %v282_v61 = vsel %vm277_vm2, %v270_v55, 0  ;;  %736 = vperm.xlu1 %868, %v733_v23   ;;  %744 = vperm.xlu2 %869, %v741_v24  }
  0xa0   : > { %291 = vmatpush.bf16.msra.mxu0 %v279_v60  ;;  %304 = vmatpush.bf16.msra.mxu1 %v282_v61 }
  0xa1   : > { %v410_v1 = vpop.permute.xlu1 %409  ;;  %v408_v2 = vpop.permute.xlu0 %407  ;;  %870 = vset.pattern.permute.xlu0 %v889_v52 }
  0xa2   : > { %v412_v5 = vsel %vm411_vm5, %v408_v2, %v410_v1  ;;  %v413_v6 = vsel %vm411_vm5, %v410_v1, %v408_v2  ;;  %v570_v30 = vpop.permute.xlu2 %569 }
  0xa3   : > { %822 = vmatmul.msk.bf16.vlgmr.msra.gmra.mxu0 %vm273_vm4, %v821_v0  ;;  %823 = vmatmul.msk.bf16.vlgmr.msra.gmra.mxu1 %vm273_vm4, %v821_v0  ;;  %v416_v7 = vmul.f32 %v414_v62, %v413_v6  ;;  %v417_v8 = vmul.f32 %v415_v63, %v412_v5  ;;  %v838_v5 = vld [vmem:[%s1059_s1 + $0x18] sm:$0xf]  ;;  %v844_v6 = vld [vmem:[%s1059_s1 + $0x20] sm:$0xf] }
  0xa4   : > { %381 = vmatpush.bf16.msrb.mxu0 %v369_v58  ;;  %394 = vmatpush.bf16.msrb.mxu1 %v372_v59  ;;  %v872_v58 = vld [vmem:[%s1060_s2 + $0x18] ss:$0 sm:$0xff] }
  0xa5   : > { %v418_v9 = vpack.c.bf16 %v416_v7, %v416_v7  ;;  %v419_v10 = vpack.c.bf16 %v417_v8, %v417_v8 }
  0xa7   : > { %v426_v11 = vsel %vm277_vm2, %v418_v9, 0  ;;  %v429_v12 = vsel %vm277_vm2, %v419_v10, 0 }
  0xa8   : > { %484 = vmatpush.bf16.msra.mxu0 %v472_v3  ;;  %497 = vmatpush.bf16.msra.mxu1 %v475_v4 }
  0xa9   : > { %438 = vmatpush.bf16.msrb.mxu2 %v426_v11  ;;  %451 = vmatpush.bf16.msrb.mxu3 %v429_v12 }
  0xac   : > { %830 = vmatmul.msk.bf16.vlgmr.msrb.gmra.mxu2 %vm273_vm4, %v829_v13  ;;  %831 = vmatmul.msk.bf16.vlgmr.msrb.gmra.mxu3 %vm273_vm4, %v829_v13 }
  0xb1   : > { %v513_v18 = vpop.permute.xlu0 %512  ;;  %v682_v59 = vpop.permute.xlu2 %681 }
  0xb2   : > { %v515_v19 = vsel %vm514_vm6, %v511_v16, %v513_v18  ;;  %v516_v20 = vsel %vm514_vm6, %v513_v18, %v511_v16 }
  0xb3   : > { %827 = vmatmul.msk.bf16.vlgmr.msrb.gmra.mxu0 %vm273_vm4, %v826_v17  ;;  %828 = vmatmul.msk.bf16.vlgmr.msrb.gmra.mxu1 %vm273_vm4, %v826_v17  ;;  %v519_v21 = vmul.f32 %v517_v14, %v515_v19  ;;  %v520_v25 = vmul.f32 %v518_v15, %v516_v20 }
  0xb5   : > { %v521_v26 = vpack.c.bf16 %v519_v21, %v519_v21  ;;  %v522_v27 = vpack.c.bf16 %v520_v25, %v520_v25 }
  0xb7   : > { %v529_v28 = vsel %vm277_vm2, %v521_v26, 0  ;;  %v532_v29 = vsel %vm277_vm2, %v522_v27, 0 }
  0xb8   : > { %541 = vmatpush.bf16.msra.mxu2 %v529_v28  ;;  %554 = vmatpush.bf16.msra.mxu3 %v532_v29 }
  0xb9   : > { %v568_v34 = vpop.permute.xlu1 %567 }
  0xba   : > { %v572_v35 = vsel %vm571_vm7, %v568_v34, %v570_v30  ;;  %v573_v36 = vsel %vm571_vm7, %v570_v30, %v568_v34 }
  0xbb   : > { %v576_v37 = vmul.f32 %v574_v31, %v572_v35  ;;  %v577_v38 = vmul.f32 %v575_v32, %v573_v36 }
  0xbc   : > { %836 = vmatmul.msk.bf16.vlgmr.msra.gmra.mxu2 %vm273_vm4, %v835_v33  ;;  %837 = vmatmul.msk.bf16.vlgmr.msra.gmra.mxu3 %vm273_vm4, %v835_v33 }
  0xbd   : > { %v578_v39 = vpack.c.bf16 %v576_v37, %v576_v37  ;;  %v579_v40 = vpack.c.bf16 %v577_v38, %v577_v38 }
  0xbf   : > { %v586_v41 = vsel %vm277_vm2, %v578_v39, 0  ;;  %v589_v42 = vsel %vm277_vm2, %v579_v40, 0 }
  0xc0   : > { %598 = vmatpush.bf16.msrb.mxu0 %v586_v41  ;;  %611 = vmatpush.bf16.msrb.mxu1 %v589_v42 }
  0xc1   : > { %v627_v46 = vpop.permute.xlu1 %626  ;;  %v625_v47 = vpop.permute.xlu0 %624 }
  0xc2   : > { %v629_v48 = vsel %vm628_vm8, %v625_v47, %v627_v46  ;;  %v630_v49 = vsel %vm628_vm8, %v627_v46, %v625_v47 }
  0xc3   : > { %833 = vmatmul.msk.bf16.vlgmr.msra.gmra.mxu0 %vm273_vm4, %v832_v45  ;;  %834 = vmatmul.msk.bf16.vlgmr.msra.gmra.mxu1 %vm273_vm4, %v832_v45  ;;  %v633_v50 = vmul.f32 %v631_v43, %v629_v48  ;;  %v634_v51 = vmul.f32 %v632_v44, %v630_v49 }
  0xc5   : > { %v635_v53 = vpack.c.bf16 %v633_v50, %v633_v50  ;;  %v636_v54 = vpack.c.bf16 %v634_v51, %v634_v51 }
  0xc7   : > { %v643_v55 = vsel %vm277_vm2, %v635_v53, 0  ;;  %v646_v56 = vsel %vm277_vm2, %v636_v54, 0 }
  0xc8   : > { %655 = vmatpush.bf16.msrb.mxu2 %v643_v55  ;;  %668 = vmatpush.bf16.msrb.mxu3 %v646_v56 }
  0xc9   : > { %v684_v60 = vpop.permute.xlu0 %683 }
  0xca   : > { %v686_v61 = vsel %vm685_vm9, %v682_v59, %v684_v60  ;;  %v687_v62 = vsel %vm685_vm9, %v684_v60, %v682_v59 }
  0xcb   : > { %v690_v63 = vmul.f32 %v871_v57, %v686_v61  ;;  %v691_v0 = vmul.f32 %v872_v58, %v687_v62 }
  0xcc   : > { %842 = vmatmul.msk.bf16.vlgmr.msrb.gmra.mxu2 %vm273_vm4, %v841_v22  ;;  %843 = vmatmul.msk.bf16.vlgmr.msrb.gmra.mxu3 %vm273_vm4, %v841_v22 }
  0xcd   : > { %v692_v1 = vpack.c.bf16 %v690_v63, %v690_v63  ;;  %v693_v2 = vpack.c.bf16 %v691_v0, %v691_v0 }
  0xcf   : > { %v700_v3 = vsel %vm277_vm2, %v692_v1, 0  ;;  %v703_v4 = vsel %vm277_vm2, %v693_v2, 0 }
  0xd0   : > { %712 = vmatpush.bf16.msra.mxu0 %v700_v3  ;;  %725 = vmatpush.bf16.msra.mxu1 %v703_v4 }
  0xd3   : > { %839 = vmatmul.msk.bf16.vlgmr.msrb.gmra.mxu0 %vm273_vm4, %v838_v5  ;;  %840 = vmatmul.msk.bf16.vlgmr.msrb.gmra.mxu1 %vm273_vm4, %v838_v5 }
  0xe3   : > { %845 = vmatmul.msk.bf16.vlgmr.msra.gmra.mxu0 %vm273_vm4, %v844_v6  ;;  %846 = vmatmul.msk.bf16.vlgmr.msra.gmra.mxu1 %vm273_vm4, %v844_v6 }
  0xf9   : > { %v745_v59 = vpop.permute.xlu2 %744 }
 0x111   : > { %v737_v54 = vpop.permute.xlu1 %736 }
 0x11e   : > { %v328_v7 = vpop.f32.mrf.mxu2  ;;  %v341_v8 = vpop.f32.mrf.mxu3 }
 0x120   : > { %v293_v9 = vpop.f32.mrf.mxu0  ;;  %v306_v10 = vpop.f32.mrf.mxu1 }
 0x121   : > { %v329_v34 = vadd.f32 %v328_v7, %v293_v9  ;;  %v342_v35 = vadd.f32 %v341_v8, %v306_v10 }
 0x126   : > { %v330_v11 = vpop.f32.mrf.mxu2  ;;  %v343_v12 = vpop.f32.mrf.mxu3 }
 0x128   : > { %v295_v13 = vpop.f32.mrf.mxu0  ;;  %v308_v14 = vpop.f32.mrf.mxu1 }
 0x12f   : > { %v440_v15 = vpop.f32.mrf.mxu2  ;;  %v453_v16 = vpop.f32.mrf.mxu3 }
 0x130   : > { %v383_v17 = vpop.f32.mrf.mxu0  ;;  %v396_v18 = vpop.f32.mrf.mxu1 }
 0x131   : > { %v400_v38 = vadd.f32 %v383_v17, %v329_v34  ;;  %v401_v39 = vadd.f32 %v396_v18, %v342_v35 }
 0x133   : > { %v457_v42 = vadd.f32 %v440_v15, %v400_v38  ;;  %v458_v43 = vadd.f32 %v453_v16, %v401_v39 }
 0x137   : > { %v442_v19 = vpop.f32.mrf.mxu2  ;;  %v455_v20 = vpop.f32.mrf.mxu3 }
 0x138   : > { %v385_v21 = vpop.f32.mrf.mxu0  ;;  %v398_v25 = vpop.f32.mrf.mxu1 }
 0x13f   : > { %v543_v26 = vpop.f32.mrf.mxu2  ;;  %v556_v27 = vpop.f32.mrf.mxu3 }
 0x140   : > { %v486_v28 = vpop.f32.mrf.mxu0  ;;  %v499_v29 = vpop.f32.mrf.mxu1 }
 0x141   : > { %v503_v44 = vadd.f32 %v486_v28, %v457_v42  ;;  %v504_v45 = vadd.f32 %v499_v29, %v458_v43 }
 0x143   : > { %v560_v50 = vadd.f32 %v543_v26, %v503_v44  ;;  %v561_v51 = vadd.f32 %v556_v27, %v504_v45 }
 0x147   : > { %v545_v30 = vpop.f32.mrf.mxu2  ;;  %v558_v31 = vpop.f32.mrf.mxu3 }
 0x148   : > { %v488_v32 = vpop.f32.mrf.mxu0  ;;  %v501_v33 = vpop.f32.mrf.mxu1 }
 0x14f   : > { %v657_v36 = vpop.f32.mrf.mxu2  ;;  %v670_v37 = vpop.f32.mrf.mxu3 }
 0x150   : > { %v600_v40 = vpop.f32.mrf.mxu0  ;;  %v613_v41 = vpop.f32.mrf.mxu1 }
 0x151   : > { %v617_v23 = vadd.f32 %v600_v40, %v560_v50  ;;  %v618_v24 = vadd.f32 %v613_v41, %v561_v51 }
 0x153   : > { %v674_v52 = vadd.f32 %v657_v36, %v617_v23  ;;  %v675_v53 = vadd.f32 %v670_v37, %v618_v24 }
 0x157   : > { %v659_v46 = vpop.f32.mrf.mxu2  ;;  %v672_v47 = vpop.f32.mrf.mxu3 }
 0x158   : > { %v602_v48 = vpop.f32.mrf.mxu0  ;;  %v615_v49 = vpop.f32.mrf.mxu1 }
 0x160   : > { %v714_v55 = vpop.f32.mrf.mxu0  ;;  %v727_v56 = vpop.f32.mrf.mxu1 }
 0x161   : > { %v731_v57 = vadd.f32 %v714_v55, %v674_v52  ;;  %v732_v58 = vadd.f32 %v727_v56, %v675_v53 }
 0x163   : > { %v739_v22 = vmul.f32 %v737_v54, %v731_v57  ;;  %v740_v60 = vmul.f32 %v737_v54, %v732_v58 }
 0x165   : > { %v747_v61 = vadd.f32 %v745_v59, %v739_v22  ;;  %v748_v62 = vadd.f32 %v745_v59, %v740_v60 }
 0x167   : > { %vm749_vm10 = vcmp.ge.f32.partialorder %v747_v61, 0.0  ;;  %vm750_vm11 = vcmp.ge.f32.partialorder %v748_v62, 0.0  ;;  %v751_v63 = vmul.f32 0.01, %v747_v61  ;;  %v752_v0 = vmul.f32 0.01, %v748_v62 }
 0x168   : > { %v716_v1 = vpop.f32.mrf.mxu0  ;;  %v729_v2 = vpop.f32.mrf.mxu1 }
 0x169   : > { %v753_v3 = vsel %vm749_vm10, %v747_v61, %v751_v63  ;;  %v754_v4 = vsel %vm750_vm11, %v748_v62, %v752_v0 }
 0x16a   : > { %755 = vst [vmem:[%s224_s17] sm:$0xff] %v753_v3 }
 0x16b   : > { %756 = vst [vmem:[%s224_s17 + $0x8] sm:$0xff] %v754_v4 }
 0x16c PF: > { %s15_s18 = sadd.s32 1, %s879_s18  }
 0x16d   : > { %p12_p4 = scmp.ge.s32.totalorder %s15_s18, 4  }
 0x16f   :  { %14 = sbr.rel (!%p12_p4) target bundleno = 1 (0x1), region = 78 }

</bundles_post_ra>
